<compile_context>
chip_gen: v7x
topology: tpu7x:2x2x1
jax: 0.10.0
libtpu: 0.0.40
codegen_flags: <defaults>
</compile_context>

<pallas_src>
import functools

import jax
import jax.numpy as jnp
from jax import lax
from jax.experimental import pallas as pl
from jax.experimental.pallas import tpu as pltpu

F32 = jnp.float32

# Mosaic's dot lowering only supports DEFAULT (single bf16 pass) and HIGHEST.
# Every dot feeding the exp-amplified softmax chain keeps HIGHEST.  The final
# vr@Wvr dot also stays HIGHEST: relaxing it to DEFAULT is estimated to consume
# most of the 2e-3 validation margin (bf16 rounding of a 32-term contraction)
# for a negligible MXU saving; the other post-softmax contraction (colsum@vis)
# was removed from the MXU entirely (exact VPU/XLU reduce in-kernel).
_PREC = lax.Precision.HIGHEST


# --------------------------- hardware detection -------------------------------
def _num_tensorcores() -> int:
    """TensorCores per chip (2 on v7x, 1 on v5e/v6e).  Best-effort, never raises."""
    try:
        info = pltpu.get_tpu_info()
        # Only trust attribute names that unambiguously mean per-chip TCs.
        for attr in ("num_tensorcores", "tensorcores_per_chip",
                     "num_cores_per_chip", "cores_per_chip",
                     "tensor_cores_per_chip"):
            val = getattr(info, attr, None)
            try:
                v = int(val)
            except (TypeError, ValueError):
                continue
            if 1 <= v <= 16:
                return v
    except Exception:  # pragma: no cover
        pass
    try:  # fallback: device-kind sniffing
        kind = jax.devices()[0].device_kind.lower()
        if "v7" in kind:
            return 2
    except Exception:  # pragma: no cover
        pass
    return 1


def _default_batch_per_step(batch: int, n_cores: int) -> int:
    if n_cores > 1:
        # v7x: keep >= n_cores grid steps so every TensorCore gets work, but give
        # each core a few batches per step once B is large enough to amortize the
        # ~0.35us per-step pipeline overhead.
        cap = max(1, min(4, batch // n_cores))
    else:
        # v5e/v6e (1 TC): unroll a handful of batches per grid step.  Capping
        # (instead of folding all of B) bounds the vreg live ranges of the
        # unrolled per-batch chains so they stay inside the 64-vreg file.
        cap = 8
    nb = 1
    for d in range(1, min(cap, batch) + 1):
        if batch % d == 0:
            nb = d
    return nb


# ------------------------------ kernel helpers --------------------------------
def _gram(a, b):
    """a @ b.T on the MXU without materializing the transpose (NT dot)."""
    return lax.dot_general(a, b, (((1,), (1,)), ((), ())),
                           precision=_PREC, preferred_element_type=F32)


def _relation_post(z):
    """MaxPool2d(1)=id -> ReLU -> InstanceNorm2d(1) -> Dropout(eval)=id
    -> z + z.T -> softmax over the flattened map."""
    z = jnp.maximum(z, 0.0)
    inv_n = 1.0 / float(z.shape[0] * z.shape[1])
    mean = jnp.sum(z) * inv_n
    var = jnp.sum(z * z) * inv_n - mean * mean       # single-pass E[z^2]-E[z]^2
    z = (z - mean) * lax.rsqrt(var + 1e-5)           # EUP rsqrt
    z = z + z.T
    # z is instance-normalized and symmetrized (bounded far inside f32 exp
    # range), so the usual max-subtraction is skipped: saves a full XLU reduce.
    e = jnp.exp(z)
    denom = jnp.sum(e, axis=1, keepdims=True)        # (N, 1)
    denom = jnp.sum(denom, axis=0, keepdims=True)    # (1, 1)
    return e * pl.reciprocal(denom, approx=True)     # EUP reciprocal (off the VPU)


def _make_kernel(nb, n, s, f, hout):
    def kernel(q_ref, vreg_ref, vis_ref, wq_ref, wv_ref, wcv_ref, wvr_ref,
               bias_ref, bpg_ref, out_ref):
        wq = wq_ref[...]                   # (Hin, S)
        wv = wv_ref[...]                   # (F, S)
        wvr = wvr_ref[...]                 # (Dv, Hout)
        wcv = wcv_ref[...]                 # (10, S): [wp ; wg(0,0) .. wg(2,2)]
        bias = bias_ref[...]               # (3, MAXW) packed row-vector biases
        bq = bias[0:1, 0:s]                # (1, S)
        bv = bias[1:2, 0:s]                # (1, S)
        bvr = bias[2:3, 0:hout]            # (1, Hout)
        bp = bpg_ref[0]                    # conv scalar bias (SMEM)
        bg = bpg_ref[1]                    # conv scalar bias (SMEM)
        wp_row = wcv[0:1, :]               # (1, S)
        wg = [wcv[1 + k:2 + k, :] for k in range(9)]   # tap (i, j) at k = i*3+j

        # ---- per-sample linears batched across the nb batches of this step ----
        q2 = q_ref[0]                                        # (nb, Hin)
        q_lin = jnp.maximum(
            jnp.dot(q2, wq, precision=_PREC,
                    preferred_element_type=F32) + bq, 0.0)   # (nb, S)
        # N is a multiple of 8 here, so this merge is a tile-aligned shape cast.
        v2 = vreg_ref[...].reshape(nb * n, f)                # (nb*N, F)
        v_lin = jnp.maximum(
            jnp.dot(v2, wv, precision=_PREC,
                    preferred_element_type=F32) + bv, 0.0)   # (nb*N, S)

        # ---- batch-invariant shift masks, hoisted out of the batch loop ----
        ridx = lax.broadcasted_iota(jnp.int32, (n, s), 0)
        m_lo = ridx >= 1           # rows where u[x-1] exists
        m_hi = ridx < n - 1        # rows where u[x+1] exists
        zero = jnp.zeros((n, s), F32)

        vr_rows = []
        for b in range(nb):        # nb is capped small (<=8): bounded unroll
            u = v_lin[b * n:(b + 1) * n, :] + q_lin[b:b + 1, :]      # (N, S)
            # s0[x] = u[x-1], s2[x] = u[x+1] (zero padded) — XLU sublane rolls.
            s0 = jnp.where(m_lo, pltpu.roll(u, shift=1, axis=0), zero)
            s2 = jnp.where(m_hi, pltpu.roll(u, shift=n - 1, axis=0), zero)

            # PairWiseRelation 1x1 conv over v_pc[s,x,y] = u[x,s]*u[y,s]:
            z_p = _gram(u * wp_row, u) + bp                          # (N, N)

            # InnerGroupRelation 3x3 dilated conv, factored per column tap j:
            #   L_j = sum_i shift_i(u) * Wg[i, j] ;  z_g = sum_j L_j @ s_j.T
            l0 = s0 * wg[0] + u * wg[3] + s2 * wg[6]
            l1 = s0 * wg[1] + u * wg[4] + s2 * wg[7]
            l2 = s0 * wg[2] + u * wg[5] + s2 * wg[8]
            z_g = _gram(l0, s0) + _gram(l1, u) + _gram(l2, s2) + bg  # (N, N)

            p_map = _relation_post(z_p)
            g_map = _relation_post(z_g)

            # calculate_vtilde + row-sum collapsed:  vr_b = 0.5*colsum(P+G)@vis_b.
            # The maps are symmetric (z+z.T before softmax), so the lane-reduce
            # row-sum equals the column-sum; keep this tiny contraction on the
            # VPU/XLU (exact f32, no serialized MXU round trip).
            c_col = jnp.sum(p_map + g_map, axis=1, keepdims=True)    # (N, 1)
            vr_rows.append(
                0.5 * jnp.sum(c_col * vis_ref[b], axis=0, keepdims=True))  # (1, Dv)

        vr = vr_rows[0] if nb == 1 else jnp.concatenate(vr_rows, axis=0)   # (nb, Dv)
        # vr_net FCNet (Linear + ReLU) batched; one dense (nb, Hout) store.
        out_ref[0] = jnp.maximum(
            jnp.dot(vr, wvr, precision=_PREC,
                    preferred_element_type=F32) + bvr, 0.0)

    return kernel


# ------------------------------- entry points ----------------------------------
@functools.partial(jax.jit, static_argnums=(4, 5))
def _mmfrra_forward_impl(q, v_reg, visual_features, params, nb, core_parallel):
    B, Hin = q.shape
    _, N, F = v_reg.shape
    _, _, Dv = visual_features.shape
    S = params["wq"].shape[1]
    Hout = params["wvr"].shape[1]
    gsteps = B // nb

    # Pack the row-vector biases into one small VMEM tile; the two true scalars
    # (conv biases) ride in SMEM and are read as scalars in-kernel.
    maxw = max(S, Hout)
    bias = jnp.zeros((3, maxw), F32)
    bias = bias.at[0, :S].set(params["bq"][0])
    bias = bias.at[1, :S].set(params["bv"][0])
    bias = bias.at[2, :Hout].set(params["bvr"][0])
    # (10, S): row 0 = 1x1 conv weight, row 1 + i*3 + j = 3x3 conv tap (i, j).
    wcv = jnp.concatenate([params["wp"], params["wg_flat"]], axis=0)
    bpg = params["bpg"][0].astype(F32)                     # (2,) -> SMEM

    # Fold the batch as (gsteps, nb, ...) so every block's trailing two dims
    # equal the full array dims (always a legal BlockSpec) and the per-step
    # q load / output store are single dense 2-D accesses.
    q3 = q.reshape(gsteps, nb, Hin)

    sem = pltpu.CORE_PARALLEL if core_parallel else pltpu.ARBITRARY

    out = pl.pallas_call(
        _make_kernel(nb, N, S, F, Hout),
        out_shape=jax.ShapeDtypeStruct((gsteps, nb, Hout), F32),
        grid=(gsteps,),
        in_specs=[
            pl.BlockSpec((1, nb, Hin), lambda b: (b, 0, 0)),    # q
            pl.BlockSpec((nb, N, F), lambda b: (b, 0, 0)),      # v_reg
            pl.BlockSpec((nb, N, Dv), lambda b: (b, 0, 0)),     # visual_features
            pl.BlockSpec((Hin, S), lambda b: (0, 0)),           # Wq
            pl.BlockSpec((F, S), lambda b: (0, 0)),             # Wv
            pl.BlockSpec((10, S), lambda b: (0, 0)),            # [wp ; wg taps]
            pl.BlockSpec((Dv, Hout), lambda b: (0, 0)),         # Wvr
            pl.BlockSpec((3, maxw), lambda b: (0, 0)),          # packed biases
            pl.BlockSpec(memory_space=pltpu.MemorySpace.SMEM),  # [bp, bg] scalars
        ],
        out_specs=pl.BlockSpec((1, nb, Hout), lambda b: (b, 0, 0)),
        compiler_params=pltpu.CompilerParams(dimension_semantics=(sem,)),
    )(q3, v_reg, visual_features,
      params["wq"], params["wv"], wcv, params["wvr"], bias, bpg)
    return out.reshape(B, Hout)


def mmfrra_forward(q, v_reg, visual_features, params, *, batch_per_step=None):
    B = q.shape[0]
    n_cores = _num_tensorcores()
    if batch_per_step is None:
        batch_per_step = _default_batch_per_step(B, n_cores)
    if batch_per_step < 1 or B % batch_per_step != 0:
        batch_per_step = 1
    # Explicit cross-TensorCore sharding of the batch-step grid axis on multi-TC
    # chips (v7x); ARBITRARY elsewhere / when there is only one grid step.
    core_parallel = (n_cores > 1) and (B // batch_per_step > 1)
    return _mmfrra_forward_impl(q, v_reg, visual_features, params,
                                batch_per_step, core_parallel)


# ----------------------------- pure-JAX reference -----------------------------
def mmfrra_reference(q, v_reg, vis, params):
    relu = jax.nn.relu
    q_lin = relu(q @ params["wq"] + params["bq"])             # (B, S)
    v_lin = relu(v_reg @ params["wv"] + params["bv"])         # (B, N, S)
    u = v_lin + q_lin[:, None, :]                             # (B, N, S)
    v_pc = jnp.einsum("bxs,bys->bsxy", u, u)                  # (B, S, N, N) "NCHW"
    bp = params["bpg"][0, 0]
    bg = params["bpg"][0, 1]
    z_p = jnp.einsum("s,bsxy->bxy", params["wp"][0], v_pc) + bp
    z_g = lax.conv_general_dilated(
        v_pc, params["wg"], window_strides=(1, 1), padding=((1, 1), (1, 1)),
        dimension_numbers=("NCHW", "OIHW", "NCHW"),
        precision=lax.Precision.HIGHEST)[:, 0] + bg

    def post(z):
        z = relu(z)
        mean = z.mean(axis=(1, 2), keepdims=True)
        var = ((z - mean) ** 2).mean(axis=(1, 2), keepdims=True)
        z = (z - mean) / jnp.sqrt(var + 1e-5)
        z = z + jnp.swapaxes(z, 1, 2)
        b = z.shape[0]
        zf = jax.nn.softmax(z.reshape(b, -1), axis=-1)
        return zf.reshape(z.shape)

    p_map = post(z_p)
    g_map = post(z_g)
    rel = 0.5 * (jnp.einsum("bxy,byd->bxd", p_map, vis)
                 + jnp.einsum("bxy,byd->bxd", g_map, vis))
    vr = rel.sum(axis=1)
    return relu(vr @ params["wvr"] + params["bvr"])


# --------------------------- deterministic weights ----------------------------
def init_params(key, hidden, img_feat, subspace, vis_dim):
    ks = jax.random.split(key, 9)

    def xavier(k, shape, fan_in, fan_out):
        lim = (6.0 / (fan_in + fan_out)) ** 0.5
        return jax.random.uniform(k, shape, F32, -lim, lim)

    wq = xavier(ks[0], (hidden, subspace), hidden, subspace)
    bq = jax.random.uniform(ks[1], (1, subspace), F32, -0.05, 0.05)
    wv = xavier(ks[2], (img_feat, subspace), img_feat, subspace)
    bv = jax.random.uniform(ks[3], (1, subspace), F32, -0.05, 0.05)
    # PairWiseRelation final conv: Conv2d(subspace, 1, kernel 1x1)
    wp_conv = xavier(ks[4], (1, subspace, 1, 1), subspace, 1)
    # InnerGroupRelation final conv: Conv2d(subspace, 1, kernel 3x3, dil=1, pad=1)
    wg_conv = xavier(ks[5], (1, subspace, 3, 3), subspace * 9, 9)
    bpg = jax.random.uniform(ks[6], (1, 2), F32, -0.05, 0.05)  # [bp, bg]
    wvr = xavier(ks[7], (vis_dim, hidden), vis_dim, hidden)
    bvr = jax.random.uniform(ks[8], (1, hidden), F32, -0.05, 0.05)

    wp = wp_conv.reshape(1, subspace)                                    # (1, S)
    # row (i*3 + j) holds W[0, :, i, j]
    wg_flat = jnp.transpose(wg_conv[0], (1, 2, 0)).reshape(9, subspace)  # (9, S)
    return dict(wq=wq, bq=bq, wv=wv, bv=bv, wp=wp, wg=wg_conv,
                wg_flat=wg_flat, bpg=bpg, wvr=wvr, bvr=bvr)


if __name__ == "__main__":
    key = jax.random.PRNGKey(0)
    B, N = 2, 16
    HIDDEN_SIZE = 32      # configs.HIDDEN_SIZE
    IMG_FEAT_SIZE = 32    # configs.IMG_FEAT_SIZE  (last dim of v_reg)
    SUBSPACE_DIM = 8      # configs.SUBSPACE_DIM
    VIS_DIM = 32          # configs.VISUAL_FEATURES_DIM
    # CONV_LAYERS_NUM = 1, DROPOUT_R irrelevant in eval mode.

    kp, kq, kv, kf = jax.random.split(key, 4)
    params = init_params(kp, HIDDEN_SIZE, IMG_FEAT_SIZE, SUBSPACE_DIM, VIS_DIM)

    q = jax.random.normal(kq, (B, HIDDEN_SIZE), F32)
    v_reg = jax.random.normal(kv, (B, N, IMG_FEAT_SIZE), F32)
    visual_features = jax.random.normal(kf, (B, N, VIS_DIM), F32)

    with jax.default_matmul_precision("highest"):
        ref = jax.block_until_ready(
            mmfrra_reference(q, v_reg, visual_features, params))

    # Validate both batch layouts: collapsed batch (single-TC default) and the
    # per-batch grid used for multi-TC sharding.
    for nb in (B, 1):
        out = jax.block_until_ready(
            mmfrra_forward(q, v_reg, visual_features, params, batch_per_step=nb))
        assert out.shape == (B, HIDDEN_SIZE), out.shape
        if not bool(jnp.allclose(out, ref, rtol=2e-3, atol=2e-3)):
            err = float(jnp.max(jnp.abs(out - ref)))
            raise AssertionError(
                f"kernel/reference mismatch (batch_per_step={nb}), max abs err={err}")

    out = jax.block_until_ready(mmfrra_forward(q, v_reg, visual_features, params))
    assert out.shape == (B, HIDDEN_SIZE), out.shape
    print("KERNEL_OK")
</pallas_src>

<mosaic_0001>
module attributes {stable_mosaic.version = 11 : i64} {
  func.func @kernel(%arg0: i32, %arg1: memref<1x2x32xf32, #tpu.memory_space<vmem>>, %arg2: memref<2x16x32xf32, #tpu.memory_space<vmem>>, %arg3: memref<2x16x32xf32, #tpu.memory_space<vmem>>, %arg4: memref<32x8xf32, #tpu.memory_space<vmem>>, %arg5: memref<32x8xf32, #tpu.memory_space<vmem>>, %arg6: memref<10x8xf32, #tpu.memory_space<vmem>>, %arg7: memref<32x32xf32, #tpu.memory_space<vmem>>, %arg8: memref<3x32xf32, #tpu.memory_space<vmem>>, %arg9: memref<2xf32, #tpu.memory_space<smem>>, %arg10: memref<1x2x32xf32, #tpu.memory_space<vmem>>) attributes {dimension_semantics = [#tpu.dimension_semantics<arbitrary>], iteration_bounds = array<i64: 1>, scalar_prefetch = 0 : i64, scratch_operands = 0 : i64, tpu.core_type = #tpu.core_type<tc>, window_params = [{transform_indices = @transform_0, window_bounds = array<i64: 1, 2, 32>}, {transform_indices = @transform_1, window_bounds = array<i64: 2, 16, 32>}, {transform_indices = @transform_2, window_bounds = array<i64: 2, 16, 32>}, {pipeline_mode = #tpu.pipeline_mode<synchronous>, transform_indices = @transform_3, window_bounds = array<i64: 32, 8>}, {pipeline_mode = #tpu.pipeline_mode<synchronous>, transform_indices = @transform_4, window_bounds = array<i64: 32, 8>}, {pipeline_mode = #tpu.pipeline_mode<synchronous>, transform_indices = @transform_5, window_bounds = array<i64: 10, 8>}, {pipeline_mode = #tpu.pipeline_mode<synchronous>, transform_indices = @transform_6, window_bounds = array<i64: 32, 32>}, {pipeline_mode = #tpu.pipeline_mode<synchronous>, transform_indices = @transform_7, window_bounds = array<i64: 3, 32>}, {transform_indices = @transform_8, window_bounds = array<i64: 2>}, {transform_indices = @transform_9, window_bounds = array<i64: 1, 2, 32>}]} {
    %c0 = arith.constant 0 : index
    %c0_0 = arith.constant 0 : index
    %0 = vector.load %arg4[%c0, %c0_0] : memref<32x8xf32, #tpu.memory_space<vmem>>, vector<32x8xf32>
    %c0_1 = arith.constant 0 : index
    %c0_2 = arith.constant 0 : index
    %1 = vector.load %arg5[%c0_1, %c0_2] : memref<32x8xf32, #tpu.memory_space<vmem>>, vector<32x8xf32>
    %c0_3 = arith.constant 0 : index
    %c0_4 = arith.constant 0 : index
    %2 = vector.load %arg7[%c0_3, %c0_4] : memref<32x32xf32, #tpu.memory_space<vmem>>, vector<32x32xf32>
    %c0_5 = arith.constant 0 : index
    %c0_6 = arith.constant 0 : index
    %3 = vector.load %arg6[%c0_5, %c0_6] : memref<10x8xf32, #tpu.memory_space<vmem>>, vector<10x8xf32>
    %c0_7 = arith.constant 0 : index
    %c0_8 = arith.constant 0 : index
    %4 = vector.load %arg8[%c0_7, %c0_8] : memref<3x32xf32, #tpu.memory_space<vmem>>, vector<3x32xf32>
    %5 = vector.extract_strided_slice %4 {offsets = [0, 0], sizes = [1, 8], strides = [1, 1]} : vector<3x32xf32> to vector<1x8xf32>
    %6 = vector.extract_strided_slice %4 {offsets = [1, 0], sizes = [1, 8], strides = [1, 1]} : vector<3x32xf32> to vector<1x8xf32>
    %7 = vector.extract_strided_slice %4 {offsets = [2, 0], sizes = [1, 32], strides = [1, 1]} : vector<3x32xf32> to vector<1x32xf32>
    %c0_9 = arith.constant 0 : index
    %8 = memref.load %arg9[%c0_9] : memref<2xf32, #tpu.memory_space<smem>>
    %c1 = arith.constant 1 : index
    %9 = memref.load %arg9[%c1] : memref<2xf32, #tpu.memory_space<smem>>
    %10 = vector.extract_strided_slice %3 {offsets = [0, 0], sizes = [1, 8], strides = [1, 1]} : vector<10x8xf32> to vector<1x8xf32>
    %11 = vector.extract_strided_slice %3 {offsets = [1, 0], sizes = [1, 8], strides = [1, 1]} : vector<10x8xf32> to vector<1x8xf32>
    %12 = vector.extract_strided_slice %3 {offsets = [2, 0], sizes = [1, 8], strides = [1, 1]} : vector<10x8xf32> to vector<1x8xf32>
    %13 = vector.extract_strided_slice %3 {offsets = [3, 0], sizes = [1, 8], strides = [1, 1]} : vector<10x8xf32> to vector<1x8xf32>
    %14 = vector.extract_strided_slice %3 {offsets = [4, 0], sizes = [1, 8], strides = [1, 1]} : vector<10x8xf32> to vector<1x8xf32>
    %15 = vector.extract_strided_slice %3 {offsets = [5, 0], sizes = [1, 8], strides = [1, 1]} : vector<10x8xf32> to vector<1x8xf32>
    %16 = vector.extract_strided_slice %3 {offsets = [6, 0], sizes = [1, 8], strides = [1, 1]} : vector<10x8xf32> to vector<1x8xf32>
    %17 = vector.extract_strided_slice %3 {offsets = [7, 0], sizes = [1, 8], strides = [1, 1]} : vector<10x8xf32> to vector<1x8xf32>
    %18 = vector.extract_strided_slice %3 {offsets = [8, 0], sizes = [1, 8], strides = [1, 1]} : vector<10x8xf32> to vector<1x8xf32>
    %19 = vector.extract_strided_slice %3 {offsets = [9, 0], sizes = [1, 8], strides = [1, 1]} : vector<10x8xf32> to vector<1x8xf32>
    %c0_10 = arith.constant 0 : index
    %c0_11 = arith.constant 0 : index
    %c0_12 = arith.constant 0 : index
    %20 = vector.load %arg1[%c0_10, %c0_11, %c0_12] : memref<1x2x32xf32, #tpu.memory_space<vmem>>, vector<1x2x32xf32>
    %21 = vector.shape_cast %20 : vector<1x2x32xf32> to vector<2x32xf32>
    %cst = arith.constant dense<0.000000e+00> : vector<2x8xf32>
    %22 = tpu.matmul %21, %0, %cst {dimension_numbers = #tpu.dot_dimension_numbers<[1], [0], [0], [1], [0, 0, 1, 1], [], []>, precision = #tpu.contract_precision<fp32>} : vector<2x32xf32>, vector<32x8xf32>, vector<2x8xf32> -> vector<2x8xf32>
    %23 = vector.broadcast %5 : vector<1x8xf32> to vector<2x8xf32>
    %24 = arith.addf %22, %23 : vector<2x8xf32>
    %cst_13 = arith.constant 0.000000e+00 : f32
    %25 = vector.broadcast %cst_13 : f32 to vector<2x8xf32>
    %26 = arith.maximumf %24, %25 : vector<2x8xf32>
    %c0_14 = arith.constant 0 : index
    %c0_15 = arith.constant 0 : index
    %c0_16 = arith.constant 0 : index
    %27 = vector.load %arg2[%c0_14, %c0_15, %c0_16] : memref<2x16x32xf32, #tpu.memory_space<vmem>>, vector<2x16x32xf32>
    %28 = vector.shape_cast %27 : vector<2x16x32xf32> to vector<32x32xf32>
    %cst_17 = arith.constant dense<0.000000e+00> : vector<32x8xf32>
    %29 = tpu.matmul %28, %1, %cst_17 {dimension_numbers = #tpu.dot_dimension_numbers<[1], [0], [0], [1], [0, 0, 1, 1], [], []>, precision = #tpu.contract_precision<fp32>} : vector<32x32xf32>, vector<32x8xf32>, vector<32x8xf32> -> vector<32x8xf32>
    %30 = vector.broadcast %6 : vector<1x8xf32> to vector<32x8xf32>
    %31 = arith.addf %29, %30 : vector<32x8xf32>
    %cst_18 = arith.constant 0.000000e+00 : f32
    %32 = vector.broadcast %cst_18 : f32 to vector<32x8xf32>
    %33 = arith.maximumf %31, %32 : vector<32x8xf32>
    %34 = tpu.iota {dimensions = array<i32: 0>} : vector<16x8xi32>
    %c1_i32 = arith.constant 1 : i32
    %35 = vector.broadcast %c1_i32 : i32 to vector<16x8xi32>
    %36 = arith.cmpi sge, %34, %35 : vector<16x8xi32>
    %c15_i32 = arith.constant 15 : i32
    %37 = vector.broadcast %c15_i32 : i32 to vector<16x8xi32>
    %38 = arith.cmpi slt, %34, %37 : vector<16x8xi32>
    %cst_19 = arith.constant 0.000000e+00 : f32
    %39 = vector.broadcast %cst_19 : f32 to vector<16x8xf32>
    %40 = vector.extract_strided_slice %33 {offsets = [0, 0], sizes = [16, 8], strides = [1, 1]} : vector<32x8xf32> to vector<16x8xf32>
    %41 = vector.extract_strided_slice %26 {offsets = [0, 0], sizes = [1, 8], strides = [1, 1]} : vector<2x8xf32> to vector<1x8xf32>
    %42 = vector.broadcast %41 : vector<1x8xf32> to vector<16x8xf32>
    %43 = arith.addf %40, %42 : vector<16x8xf32>
    %c1_i32_20 = arith.constant 1 : i32
    %44 = tpu.dynamic_rotate %43 by %c1_i32_20 dim 0 : vector<16x8xf32>, i32 -> vector<16x8xf32>
    %45 = arith.select %36, %44, %39 : vector<16x8xi1>, vector<16x8xf32>
    %c15_i32_21 = arith.constant 15 : i32
    %46 = tpu.dynamic_rotate %43 by %c15_i32_21 dim 0 : vector<16x8xf32>, i32 -> vector<16x8xf32>
    %47 = arith.select %38, %46, %39 : vector<16x8xi1>, vector<16x8xf32>
    %48 = vector.broadcast %10 : vector<1x8xf32> to vector<16x8xf32>
    %49 = arith.mulf %43, %48 : vector<16x8xf32>
    %cst_22 = arith.constant dense<0.000000e+00> : vector<16x16xf32>
    %50 = tpu.matmul %49, %43, %cst_22 {dimension_numbers = #tpu.dot_dimension_numbers<[1], [1], [0], [0], [0, 0, 1, 0], [], []>, precision = #tpu.contract_precision<fp32>} : vector<16x8xf32>, vector<16x8xf32>, vector<16x16xf32> -> vector<16x16xf32>
    %51 = vector.broadcast %8 : f32 to vector<16x16xf32>
    %52 = arith.addf %50, %51 : vector<16x16xf32>
    %53 = vector.broadcast %11 : vector<1x8xf32> to vector<16x8xf32>
    %54 = arith.mulf %45, %53 : vector<16x8xf32>
    %55 = vector.broadcast %14 : vector<1x8xf32> to vector<16x8xf32>
    %56 = arith.mulf %43, %55 : vector<16x8xf32>
    %57 = arith.addf %54, %56 : vector<16x8xf32>
    %58 = vector.broadcast %17 : vector<1x8xf32> to vector<16x8xf32>
    %59 = arith.mulf %47, %58 : vector<16x8xf32>
    %60 = arith.addf %57, %59 : vector<16x8xf32>
    %61 = vector.broadcast %12 : vector<1x8xf32> to vector<16x8xf32>
    %62 = arith.mulf %45, %61 : vector<16x8xf32>
    %63 = vector.broadcast %15 : vector<1x8xf32> to vector<16x8xf32>
    %64 = arith.mulf %43, %63 : vector<16x8xf32>
    %65 = arith.addf %62, %64 : vector<16x8xf32>
    %66 = vector.broadcast %18 : vector<1x8xf32> to vector<16x8xf32>
    %67 = arith.mulf %47, %66 : vector<16x8xf32>
    %68 = arith.addf %65, %67 : vector<16x8xf32>
    %69 = vector.broadcast %13 : vector<1x8xf32> to vector<16x8xf32>
    %70 = arith.mulf %45, %69 : vector<16x8xf32>
    %71 = vector.broadcast %16 : vector<1x8xf32> to vector<16x8xf32>
    %72 = arith.mulf %43, %71 : vector<16x8xf32>
    %73 = arith.addf %70, %72 : vector<16x8xf32>
    %74 = vector.broadcast %19 : vector<1x8xf32> to vector<16x8xf32>
    %75 = arith.mulf %47, %74 : vector<16x8xf32>
    %76 = arith.addf %73, %75 : vector<16x8xf32>
    %cst_23 = arith.constant dense<0.000000e+00> : vector<16x16xf32>
    %77 = tpu.matmul %60, %45, %cst_23 {dimension_numbers = #tpu.dot_dimension_numbers<[1], [1], [0], [0], [0, 0, 1, 0], [], []>, precision = #tpu.contract_precision<fp32>} : vector<16x8xf32>, vector<16x8xf32>, vector<16x16xf32> -> vector<16x16xf32>
    %cst_24 = arith.constant dense<0.000000e+00> : vector<16x16xf32>
    %78 = tpu.matmul %68, %43, %cst_24 {dimension_numbers = #tpu.dot_dimension_numbers<[1], [1], [0], [0], [0, 0, 1, 0], [], []>, precision = #tpu.contract_precision<fp32>} : vector<16x8xf32>, vector<16x8xf32>, vector<16x16xf32> -> vector<16x16xf32>
    %79 = arith.addf %77, %78 : vector<16x16xf32>
    %cst_25 = arith.constant dense<0.000000e+00> : vector<16x16xf32>
    %80 = tpu.matmul %76, %47, %cst_25 {dimension_numbers = #tpu.dot_dimension_numbers<[1], [1], [0], [0], [0, 0, 1, 0], [], []>, precision = #tpu.contract_precision<fp32>} : vector<16x8xf32>, vector<16x8xf32>, vector<16x16xf32> -> vector<16x16xf32>
    %81 = arith.addf %79, %80 : vector<16x16xf32>
    %82 = vector.broadcast %9 : f32 to vector<16x16xf32>
    %83 = arith.addf %81, %82 : vector<16x16xf32>
    %cst_26 = arith.constant 0.000000e+00 : f32
    %84 = vector.broadcast %cst_26 : f32 to vector<16x16xf32>
    %85 = arith.maximumf %52, %84 : vector<16x16xf32>
    %86 = vector.shape_cast %85 : vector<16x16xf32> to vector<1x16x16xf32>
    %cst_27 = arith.constant dense<0.000000e+00> : vector<1xf32>
    %87 = vector.multi_reduction <add>, %86, %cst_27 [1, 2] : vector<1x16x16xf32> to vector<1xf32>
    %88 = vector.shape_cast %87 : vector<1xf32> to vector<1x1x1xf32>
    %89 = vector.extract %88[0, 0, 0] : f32 from vector<1x1x1xf32>
    %cst_28 = arith.constant 3.906250e-03 : f32
    %90 = arith.mulf %89, %cst_28 : f32
    %91 = arith.mulf %85, %85 : vector<16x16xf32>
    %92 = vector.shape_cast %91 : vector<16x16xf32> to vector<1x16x16xf32>
    %cst_29 = arith.constant dense<0.000000e+00> : vector<1xf32>
    %93 = vector.multi_reduction <add>, %92, %cst_29 [1, 2] : vector<1x16x16xf32> to vector<1xf32>
    %94 = vector.shape_cast %93 : vector<1xf32> to vector<1x1x1xf32>
    %95 = vector.extract %94[0, 0, 0] : f32 from vector<1x1x1xf32>
    %cst_30 = arith.constant 3.906250e-03 : f32
    %96 = arith.mulf %95, %cst_30 : f32
    %97 = arith.mulf %90, %90 : f32
    %98 = arith.subf %96, %97 : f32
    %99 = vector.broadcast %90 : f32 to vector<16x16xf32>
    %100 = arith.subf %85, %99 : vector<16x16xf32>
    %cst_31 = arith.constant 9.99999974E-6 : f32
    %101 = arith.addf %98, %cst_31 : f32
    %102 = math.rsqrt %101 : f32
    %103 = vector.broadcast %102 : f32 to vector<16x16xf32>
    %104 = arith.mulf %100, %103 : vector<16x16xf32>
    %105 = tpu.transpose %104, [1, 0] : vector<16x16xf32> -> vector<16x16xf32>
    %106 = arith.addf %104, %105 : vector<16x16xf32>
    %107 = math.exp %106 : vector<16x16xf32>
    %cst_32 = arith.constant dense<0.000000e+00> : vector<16xf32>
    %108 = vector.multi_reduction <add>, %107, %cst_32 [1] : vector<16x16xf32> to vector<16xf32>
    %109 = vector.shape_cast %108 : vector<16xf32> to vector<16x1xf32>
    %cst_33 = arith.constant dense<0.000000e+00> : vector<1xf32>
    %110 = vector.multi_reduction <add>, %109, %cst_33 [0] : vector<16x1xf32> to vector<1xf32>
    %111 = vector.shape_cast %110 : vector<1xf32> to vector<1x1xf32>
    %112 = tpu.reciprocal %111 {approx = true} : vector<1x1xf32> -> vector<1x1xf32>
    %113 = vector.broadcast %112 : vector<1x1xf32> to vector<16x16xf32>
    %114 = arith.mulf %107, %113 : vector<16x16xf32>
    %cst_34 = arith.constant 0.000000e+00 : f32
    %115 = vector.broadcast %cst_34 : f32 to vector<16x16xf32>
    %116 = arith.maximumf %83, %115 : vector<16x16xf32>
    %117 = vector.shape_cast %116 : vector<16x16xf32> to vector<1x16x16xf32>
    %cst_35 = arith.constant dense<0.000000e+00> : vector<1xf32>
    %118 = vector.multi_reduction <add>, %117, %cst_35 [1, 2] : vector<1x16x16xf32> to vector<1xf32>
    %119 = vector.shape_cast %118 : vector<1xf32> to vector<1x1x1xf32>
    %120 = vector.extract %119[0, 0, 0] : f32 from vector<1x1x1xf32>
    %cst_36 = arith.constant 3.906250e-03 : f32
    %121 = arith.mulf %120, %cst_36 : f32
    %122 = arith.mulf %116, %116 : vector<16x16xf32>
    %123 = vector.shape_cast %122 : vector<16x16xf32> to vector<1x16x16xf32>
    %cst_37 = arith.constant dense<0.000000e+00> : vector<1xf32>
    %124 = vector.multi_reduction <add>, %123, %cst_37 [1, 2] : vector<1x16x16xf32> to vector<1xf32>
    %125 = vector.shape_cast %124 : vector<1xf32> to vector<1x1x1xf32>
    %126 = vector.extract %125[0, 0, 0] : f32 from vector<1x1x1xf32>
    %cst_38 = arith.constant 3.906250e-03 : f32
    %127 = arith.mulf %126, %cst_38 : f32
    %128 = arith.mulf %121, %121 : f32
    %129 = arith.subf %127, %128 : f32
    %130 = vector.broadcast %121 : f32 to vector<16x16xf32>
    %131 = arith.subf %116, %130 : vector<16x16xf32>
    %cst_39 = arith.constant 9.99999974E-6 : f32
    %132 = arith.addf %129, %cst_39 : f32
    %133 = math.rsqrt %132 : f32
    %134 = vector.broadcast %133 : f32 to vector<16x16xf32>
    %135 = arith.mulf %131, %134 : vector<16x16xf32>
    %136 = tpu.transpose %135, [1, 0] : vector<16x16xf32> -> vector<16x16xf32>
    %137 = arith.addf %135, %136 : vector<16x16xf32>
    %138 = math.exp %137 : vector<16x16xf32>
    %cst_40 = arith.constant dense<0.000000e+00> : vector<16xf32>
    %139 = vector.multi_reduction <add>, %138, %cst_40 [1] : vector<16x16xf32> to vector<16xf32>
    %140 = vector.shape_cast %139 : vector<16xf32> to vector<16x1xf32>
    %cst_41 = arith.constant dense<0.000000e+00> : vector<1xf32>
    %141 = vector.multi_reduction <add>, %140, %cst_41 [0] : vector<16x1xf32> to vector<1xf32>
    %142 = vector.shape_cast %141 : vector<1xf32> to vector<1x1xf32>
    %143 = tpu.reciprocal %142 {approx = true} : vector<1x1xf32> -> vector<1x1xf32>
    %144 = vector.broadcast %143 : vector<1x1xf32> to vector<16x16xf32>
    %145 = arith.mulf %138, %144 : vector<16x16xf32>
    %146 = arith.addf %114, %145 : vector<16x16xf32>
    %cst_42 = arith.constant dense<0.000000e+00> : vector<16xf32>
    %147 = vector.multi_reduction <add>, %146, %cst_42 [1] : vector<16x16xf32> to vector<16xf32>
    %148 = vector.shape_cast %147 : vector<16xf32> to vector<16x1xf32>
    %c0_43 = arith.constant 0 : index
    %c0_44 = arith.constant 0 : index
    %c0_45 = arith.constant 0 : index
    %149 = vector.load %arg3[%c0_43, %c0_44, %c0_45] : memref<2x16x32xf32, #tpu.memory_space<vmem>>, vector<1x16x32xf32>
    %150 = vector.shape_cast %149 : vector<1x16x32xf32> to vector<16x32xf32>
    %151 = vector.broadcast %148 : vector<16x1xf32> to vector<16x32xf32>
    %152 = arith.mulf %151, %150 : vector<16x32xf32>
    %cst_46 = arith.constant dense<0.000000e+00> : vector<32xf32>
    %153 = vector.multi_reduction <add>, %152, %cst_46 [0] : vector<16x32xf32> to vector<32xf32>
    %154 = vector.shape_cast %153 : vector<32xf32> to vector<1x32xf32>
    %cst_47 = arith.constant 5.000000e-01 : f32
    %155 = vector.broadcast %cst_47 : f32 to vector<1x32xf32>
    %156 = arith.mulf %155, %154 : vector<1x32xf32>
    %157 = vector.extract_strided_slice %33 {offsets = [16, 0], sizes = [16, 8], strides = [1, 1]} : vector<32x8xf32> to vector<16x8xf32>
    %158 = vector.extract_strided_slice %26 {offsets = [1, 0], sizes = [1, 8], strides = [1, 1]} : vector<2x8xf32> to vector<1x8xf32>
    %159 = vector.broadcast %158 : vector<1x8xf32> to vector<16x8xf32>
    %160 = arith.addf %157, %159 : vector<16x8xf32>
    %c1_i32_48 = arith.constant 1 : i32
    %161 = tpu.dynamic_rotate %160 by %c1_i32_48 dim 0 : vector<16x8xf32>, i32 -> vector<16x8xf32>
    %162 = arith.select %36, %161, %39 : vector<16x8xi1>, vector<16x8xf32>
    %c15_i32_49 = arith.constant 15 : i32
    %163 = tpu.dynamic_rotate %160 by %c15_i32_49 dim 0 : vector<16x8xf32>, i32 -> vector<16x8xf32>
    %164 = arith.select %38, %163, %39 : vector<16x8xi1>, vector<16x8xf32>
    %165 = vector.broadcast %10 : vector<1x8xf32> to vector<16x8xf32>
    %166 = arith.mulf %160, %165 : vector<16x8xf32>
    %cst_50 = arith.constant dense<0.000000e+00> : vector<16x16xf32>
    %167 = tpu.matmul %166, %160, %cst_50 {dimension_numbers = #tpu.dot_dimension_numbers<[1], [1], [0], [0], [0, 0, 1, 0], [], []>, precision = #tpu.contract_precision<fp32>} : vector<16x8xf32>, vector<16x8xf32>, vector<16x16xf32> -> vector<16x16xf32>
    %168 = vector.broadcast %8 : f32 to vector<16x16xf32>
    %169 = arith.addf %167, %168 : vector<16x16xf32>
    %170 = vector.broadcast %11 : vector<1x8xf32> to vector<16x8xf32>
    %171 = arith.mulf %162, %170 : vector<16x8xf32>
    %172 = vector.broadcast %14 : vector<1x8xf32> to vector<16x8xf32>
    %173 = arith.mulf %160, %172 : vector<16x8xf32>
    %174 = arith.addf %171, %173 : vector<16x8xf32>
    %175 = vector.broadcast %17 : vector<1x8xf32> to vector<16x8xf32>
    %176 = arith.mulf %164, %175 : vector<16x8xf32>
    %177 = arith.addf %174, %176 : vector<16x8xf32>
    %178 = vector.broadcast %12 : vector<1x8xf32> to vector<16x8xf32>
    %179 = arith.mulf %162, %178 : vector<16x8xf32>
    %180 = vector.broadcast %15 : vector<1x8xf32> to vector<16x8xf32>
    %181 = arith.mulf %160, %180 : vector<16x8xf32>
    %182 = arith.addf %179, %181 : vector<16x8xf32>
    %183 = vector.broadcast %18 : vector<1x8xf32> to vector<16x8xf32>
    %184 = arith.mulf %164, %183 : vector<16x8xf32>
    %185 = arith.addf %182, %184 : vector<16x8xf32>
    %186 = vector.broadcast %13 : vector<1x8xf32> to vector<16x8xf32>
    %187 = arith.mulf %162, %186 : vector<16x8xf32>
    %188 = vector.broadcast %16 : vector<1x8xf32> to vector<16x8xf32>
    %189 = arith.mulf %160, %188 : vector<16x8xf32>
    %190 = arith.addf %187, %189 : vector<16x8xf32>
    %191 = vector.broadcast %19 : vector<1x8xf32> to vector<16x8xf32>
    %192 = arith.mulf %164, %191 : vector<16x8xf32>
    %193 = arith.addf %190, %192 : vector<16x8xf32>
    %cst_51 = arith.constant dense<0.000000e+00> : vector<16x16xf32>
    %194 = tpu.matmul %177, %162, %cst_51 {dimension_numbers = #tpu.dot_dimension_numbers<[1], [1], [0], [0], [0, 0, 1, 0], [], []>, precision = #tpu.contract_precision<fp32>} : vector<16x8xf32>, vector<16x8xf32>, vector<16x16xf32> -> vector<16x16xf32>
    %cst_52 = arith.constant dense<0.000000e+00> : vector<16x16xf32>
    %195 = tpu.matmul %185, %160, %cst_52 {dimension_numbers = #tpu.dot_dimension_numbers<[1], [1], [0], [0], [0, 0, 1, 0], [], []>, precision = #tpu.contract_precision<fp32>} : vector<16x8xf32>, vector<16x8xf32>, vector<16x16xf32> -> vector<16x16xf32>
    %196 = arith.addf %194, %195 : vector<16x16xf32>
    %cst_53 = arith.constant dense<0.000000e+00> : vector<16x16xf32>
    %197 = tpu.matmul %193, %164, %cst_53 {dimension_numbers = #tpu.dot_dimension_numbers<[1], [1], [0], [0], [0, 0, 1, 0], [], []>, precision = #tpu.contract_precision<fp32>} : vector<16x8xf32>, vector<16x8xf32>, vector<16x16xf32> -> vector<16x16xf32>
    %198 = arith.addf %196, %197 : vector<16x16xf32>
    %199 = vector.broadcast %9 : f32 to vector<16x16xf32>
    %200 = arith.addf %198, %199 : vector<16x16xf32>
    %cst_54 = arith.constant 0.000000e+00 : f32
    %201 = vector.broadcast %cst_54 : f32 to vector<16x16xf32>
    %202 = arith.maximumf %169, %201 : vector<16x16xf32>
    %203 = vector.shape_cast %202 : vector<16x16xf32> to vector<1x16x16xf32>
    %cst_55 = arith.constant dense<0.000000e+00> : vector<1xf32>
    %204 = vector.multi_reduction <add>, %203, %cst_55 [1, 2] : vector<1x16x16xf32> to vector<1xf32>
    %205 = vector.shape_cast %204 : vector<1xf32> to vector<1x1x1xf32>
    %206 = vector.extract %205[0, 0, 0] : f32 from vector<1x1x1xf32>
    %cst_56 = arith.constant 3.906250e-03 : f32
    %207 = arith.mulf %206, %cst_56 : f32
    %208 = arith.mulf %202, %202 : vector<16x16xf32>
    %209 = vector.shape_cast %208 : vector<16x16xf32> to vector<1x16x16xf32>
    %cst_57 = arith.constant dense<0.000000e+00> : vector<1xf32>
    %210 = vector.multi_reduction <add>, %209, %cst_57 [1, 2] : vector<1x16x16xf32> to vector<1xf32>
    %211 = vector.shape_cast %210 : vector<1xf32> to vector<1x1x1xf32>
    %212 = vector.extract %211[0, 0, 0] : f32 from vector<1x1x1xf32>
    %cst_58 = arith.constant 3.906250e-03 : f32
    %213 = arith.mulf %212, %cst_58 : f32
    %214 = arith.mulf %207, %207 : f32
    %215 = arith.subf %213, %214 : f32
    %216 = vector.broadcast %207 : f32 to vector<16x16xf32>
    %217 = arith.subf %202, %216 : vector<16x16xf32>
    %cst_59 = arith.constant 9.99999974E-6 : f32
    %218 = arith.addf %215, %cst_59 : f32
    %219 = math.rsqrt %218 : f32
    %220 = vector.broadcast %219 : f32 to vector<16x16xf32>
    %221 = arith.mulf %217, %220 : vector<16x16xf32>
    %222 = tpu.transpose %221, [1, 0] : vector<16x16xf32> -> vector<16x16xf32>
    %223 = arith.addf %221, %222 : vector<16x16xf32>
    %224 = math.exp %223 : vector<16x16xf32>
    %cst_60 = arith.constant dense<0.000000e+00> : vector<16xf32>
    %225 = vector.multi_reduction <add>, %224, %cst_60 [1] : vector<16x16xf32> to vector<16xf32>
    %226 = vector.shape_cast %225 : vector<16xf32> to vector<16x1xf32>
    %cst_61 = arith.constant dense<0.000000e+00> : vector<1xf32>
    %227 = vector.multi_reduction <add>, %226, %cst_61 [0] : vector<16x1xf32> to vector<1xf32>
    %228 = vector.shape_cast %227 : vector<1xf32> to vector<1x1xf32>
    %229 = tpu.reciprocal %228 {approx = true} : vector<1x1xf32> -> vector<1x1xf32>
    %230 = vector.broadcast %229 : vector<1x1xf32> to vector<16x16xf32>
    %231 = arith.mulf %224, %230 : vector<16x16xf32>
    %cst_62 = arith.constant 0.000000e+00 : f32
    %232 = vector.broadcast %cst_62 : f32 to vector<16x16xf32>
    %233 = arith.maximumf %200, %232 : vector<16x16xf32>
    %234 = vector.shape_cast %233 : vector<16x16xf32> to vector<1x16x16xf32>
    %cst_63 = arith.constant dense<0.000000e+00> : vector<1xf32>
    %235 = vector.multi_reduction <add>, %234, %cst_63 [1, 2] : vector<1x16x16xf32> to vector<1xf32>
    %236 = vector.shape_cast %235 : vector<1xf32> to vector<1x1x1xf32>
    %237 = vector.extract %236[0, 0, 0] : f32 from vector<1x1x1xf32>
    %cst_64 = arith.constant 3.906250e-03 : f32
    %238 = arith.mulf %237, %cst_64 : f32
    %239 = arith.mulf %233, %233 : vector<16x16xf32>
    %240 = vector.shape_cast %239 : vector<16x16xf32> to vector<1x16x16xf32>
    %cst_65 = arith.constant dense<0.000000e+00> : vector<1xf32>
    %241 = vector.multi_reduction <add>, %240, %cst_65 [1, 2] : vector<1x16x16xf32> to vector<1xf32>
    %242 = vector.shape_cast %241 : vector<1xf32> to vector<1x1x1xf32>
    %243 = vector.extract %242[0, 0, 0] : f32 from vector<1x1x1xf32>
    %cst_66 = arith.constant 3.906250e-03 : f32
    %244 = arith.mulf %243, %cst_66 : f32
    %245 = arith.mulf %238, %238 : f32
    %246 = arith.subf %244, %245 : f32
    %247 = vector.broadcast %238 : f32 to vector<16x16xf32>
    %248 = arith.subf %233, %247 : vector<16x16xf32>
    %cst_67 = arith.constant 9.99999974E-6 : f32
    %249 = arith.addf %246, %cst_67 : f32
    %250 = math.rsqrt %249 : f32
    %251 = vector.broadcast %250 : f32 to vector<16x16xf32>
    %252 = arith.mulf %248, %251 : vector<16x16xf32>
    %253 = tpu.transpose %252, [1, 0] : vector<16x16xf32> -> vector<16x16xf32>
    %254 = arith.addf %252, %253 : vector<16x16xf32>
    %255 = math.exp %254 : vector<16x16xf32>
    %cst_68 = arith.constant dense<0.000000e+00> : vector<16xf32>
    %256 = vector.multi_reduction <add>, %255, %cst_68 [1] : vector<16x16xf32> to vector<16xf32>
    %257 = vector.shape_cast %256 : vector<16xf32> to vector<16x1xf32>
    %cst_69 = arith.constant dense<0.000000e+00> : vector<1xf32>
    %258 = vector.multi_reduction <add>, %257, %cst_69 [0] : vector<16x1xf32> to vector<1xf32>
    %259 = vector.shape_cast %258 : vector<1xf32> to vector<1x1xf32>
    %260 = tpu.reciprocal %259 {approx = true} : vector<1x1xf32> -> vector<1x1xf32>
    %261 = vector.broadcast %260 : vector<1x1xf32> to vector<16x16xf32>
    %262 = arith.mulf %255, %261 : vector<16x16xf32>
    %263 = arith.addf %231, %262 : vector<16x16xf32>
    %cst_70 = arith.constant dense<0.000000e+00> : vector<16xf32>
    %264 = vector.multi_reduction <add>, %263, %cst_70 [1] : vector<16x16xf32> to vector<16xf32>
    %265 = vector.shape_cast %264 : vector<16xf32> to vector<16x1xf32>
    %c1_71 = arith.constant 1 : index
    %c0_72 = arith.constant 0 : index
    %c0_73 = arith.constant 0 : index
    %266 = vector.load %arg3[%c1_71, %c0_72, %c0_73] : memref<2x16x32xf32, #tpu.memory_space<vmem>>, vector<1x16x32xf32>
    %267 = vector.shape_cast %266 : vector<1x16x32xf32> to vector<16x32xf32>
    %268 = vector.broadcast %265 : vector<16x1xf32> to vector<16x32xf32>
    %269 = arith.mulf %268, %267 : vector<16x32xf32>
    %cst_74 = arith.constant dense<0.000000e+00> : vector<32xf32>
    %270 = vector.multi_reduction <add>, %269, %cst_74 [0] : vector<16x32xf32> to vector<32xf32>
    %271 = vector.shape_cast %270 : vector<32xf32> to vector<1x32xf32>
    %cst_75 = arith.constant 5.000000e-01 : f32
    %272 = vector.broadcast %cst_75 : f32 to vector<1x32xf32>
    %273 = arith.mulf %272, %271 : vector<1x32xf32>
    %274 = tpu.concatenate %156, %273 in 0 : vector<1x32xf32>, vector<1x32xf32> -> vector<2x32xf32>
    %cst_76 = arith.constant dense<0.000000e+00> : vector<2x32xf32>
    %275 = tpu.matmul %274, %2, %cst_76 {dimension_numbers = #tpu.dot_dimension_numbers<[1], [0], [0], [1], [0, 0, 1, 1], [], []>, precision = #tpu.contract_precision<fp32>} : vector<2x32xf32>, vector<32x32xf32>, vector<2x32xf32> -> vector<2x32xf32>
    %276 = vector.broadcast %7 : vector<1x32xf32> to vector<2x32xf32>
    %277 = arith.addf %275, %276 : vector<2x32xf32>
    %cst_77 = arith.constant 0.000000e+00 : f32
    %278 = vector.broadcast %cst_77 : f32 to vector<2x32xf32>
    %279 = arith.maximumf %277, %278 : vector<2x32xf32>
    %c0_78 = arith.constant 0 : index
    %c0_79 = arith.constant 0 : index
    %c0_80 = arith.constant 0 : index
    %280 = vector.load %arg10[%c0_78, %c0_79, %c0_80] : memref<1x2x32xf32, #tpu.memory_space<vmem>>, vector<1x2x32xf32>
    %281 = vector.shape_cast %280 : vector<1x2x32xf32> to vector<2x32xf32>
    %282 = vector.shape_cast %279 : vector<2x32xf32> to vector<1x2x32xf32>
    tpu.vector_store %arg10[%c0_78, %c0_79, %c0_80], %282 {strides = array<i32>} : memref<1x2x32xf32, #tpu.memory_space<vmem>>, vector<1x2x32xf32>,
    return
  }
  func.func @transform_0(%arg0: i32) -> (i32, i32, i32) {
    %c0_i32 = arith.constant 0 : i32
    %c0_i32_0 = arith.constant 0 : i32
    %c0_i32_1 = arith.constant 0 : i32
    return %arg0, %c0_i32, %c0_i32_0 : i32, i32, i32
  }
  func.func @transform_1(%arg0: i32) -> (i32, i32, i32) {
    %c0_i32 = arith.constant 0 : i32
    %c0_i32_0 = arith.constant 0 : i32
    %c0_i32_1 = arith.constant 0 : i32
    return %arg0, %c0_i32, %c0_i32_0 : i32, i32, i32
  }
  func.func @transform_2(%arg0: i32) -> (i32, i32, i32) {
    %c0_i32 = arith.constant 0 : i32
    %c0_i32_0 = arith.constant 0 : i32
    %c0_i32_1 = arith.constant 0 : i32
    return %arg0, %c0_i32, %c0_i32_0 : i32, i32, i32
  }
  func.func @transform_3(%arg0: i32) -> (i32, i32) {
    %c0_i32 = arith.constant 0 : i32
    %c0_i32_0 = arith.constant 0 : i32
    %c0_i32_1 = arith.constant 0 : i32
    return %c0_i32, %c0_i32_0 : i32, i32
  }
  func.func @transform_4(%arg0: i32) -> (i32, i32) {
    %c0_i32 = arith.constant 0 : i32
    %c0_i32_0 = arith.constant 0 : i32
    %c0_i32_1 = arith.constant 0 : i32
    return %c0_i32, %c0_i32_0 : i32, i32
  }
  func.func @transform_5(%arg0: i32) -> (i32, i32) {
    %c0_i32 = arith.constant 0 : i32
    %c0_i32_0 = arith.constant 0 : i32
    %c0_i32_1 = arith.constant 0 : i32
    return %c0_i32, %c0_i32_0 : i32, i32
  }
  func.func @transform_6(%arg0: i32) -> (i32, i32) {
    %c0_i32 = arith.constant 0 : i32
    %c0_i32_0 = arith.constant 0 : i32
    %c0_i32_1 = arith.constant 0 : i32
    return %c0_i32, %c0_i32_0 : i32, i32
  }
  func.func @transform_7(%arg0: i32) -> (i32, i32) {
    %c0_i32 = arith.constant 0 : i32
    %c0_i32_0 = arith.constant 0 : i32
    %c0_i32_1 = arith.constant 0 : i32
    return %c0_i32, %c0_i32_0 : i32, i32
  }
  func.func @transform_8(%arg0: i32) -> i32 {
    %c0_i32 = arith.constant 0 : i32
    %c0_i32_0 = arith.constant 0 : i32
    return %c0_i32 : i32
  }
  func.func @transform_9(%arg0: i32) -> (i32, i32, i32) {
    %c0_i32 = arith.constant 0 : i32
    %c0_i32_0 = arith.constant 0 : i32
    %c0_i32_1 = arith.constant 0 : i32
    return %arg0, %c0_i32, %c0_i32_0 : i32, i32, i32
  }
}

</mosaic_0001>

<bundles_post_ra>
// kernel: _mmfrra_forward_impl.1
= control target key start
LH: loop header
LB: loop body
LE: loop exit
PB: predicated region body
PF: predicated region fallthrough
CT: control target
= control target key end

     0   :  { %14 = vsyncpa [#allocation4], 0  ;;  %s8842_s0 = inlined_call_operand.vmem [shape: f32[1,2,32], index: 0, kind: input, shape index: {}]   ;;  %s8843_s1 = inlined_call_operand.vmem [shape: f32[2,16,32], index: 1, kind: input, shape index: {}]   ;;  %s8844_s2 = inlined_call_operand.vmem [shape: f32[2,16,32], index: 2, kind: input, shape index: {}]   ;;  %s8845_s3 = inlined_call_operand.vmem [shape: f32[32,8], index: 3, kind: input, shape index: {}]   ;;  %s8846_s4 = inlined_call_operand.vmem [shape: f32[32,8], index: 4, kind: input, shape index: {}]   ;;  %s8847_s5 = inlined_call_operand.vmem [shape: f32[10,8], index: 5, kind: input, shape index: {}]   ;;  %s8848_s6 = inlined_call_operand.vmem [shape: f32[32,32], index: 6, kind: input, shape index: {}]   ;;  %s8849_s7 = inlined_call_operand.vmem [shape: f32[3,32], index: 7, kind: input, shape index: {}]   ;;  %s8850_s8 = inlined_call_operand.vmem [shape: f32[2], index: 8, kind: input, shape index: {}]   ;;  %s8851_s9 = inlined_call_operand.hbm [shape: f32[1,2,32], index: 9, kind: output, shape index: {}]  }
   0x1   :  { %15 = vsyncpa [#allocation3], 0  ;;  %s38_s11 = sshll.u32 %s8850_s8, 4  ;;  %s39_s11 = int_to_ptr.vmem [resolvable:$true] %s38_s11 }
   0x2   :  { %s7764_s12 = scalar_lea.vmem %s39_s11, 16  ;;  %p7769_p1 = scmp.lt.s32.totalorder %s39_s11, %s39_s11 }
   0x3   :  { %p7765_p0 = scmp.ne.s32.totalorder %s39_s11, %s7764_s12  ;;  %p7770_p2 = scmp.lt.s32.totalorder %s7764_s12, %s7764_s12 }
   0x5   :  { %p7771_p3 = por %p7770_p2, %p7769_p1 }
   0x7   :  { %p7772_p4 = pnand %p7771_p3, %p7765_p0 }
   0x9   :  { %7775 = shalt.err (!%p7772_p4)
}
   0xa   :  { %s7802_s13 = smov [#allocation2]  }
   0xb   :  { %41 = dma.vmem_to_smem %s39_s11, 16, %s7802_s13, [#allocation4]  }
   0xc   :  { %7798 = dma.done.wait [#allocation4], 16  }
   0xd   :  { %7799 = vsyncadd [#allocation4], 4294967280 }
   0xe   :  { %45 = sfence }
   0xf   :  { %v46_v0 = vld [vmem:[%s8845_s3] sm:$0xff]  ;;  %v47_v1 = vld [vmem:[%s8845_s3 + $0x8] sm:$0xff]  ;;  %v48_v2 = vld [vmem:[%s8845_s3 + $0x10] sm:$0xff]  ;;  %v8855_v3 = vmov 0.0|0.0   ;;  %vm7804_vm0 = vmmov 0   ;;  %v8853_v10 = vmov 0.0  }
  0x10   :  { %7253 = vmatprep.subr.bf16.mxu1 %v8855_v3  ;;  %v73_v4 = vand.u32 4294901760, %v46_v0  ;;  %v76_v5 = vand.u32 4294901760, %v47_v1  ;;  %7271 = vmatprep.subr.bf16.mxu0 %v8855_v3  ;;  %v49_v6 = vld [vmem:[%s8845_s3 + $0x18] sm:$0xff]  ;;  %v79_v7 = vand.u32 4294901760, %v48_v2  ;;  %v63_v8 = vld [vmem:[%s8842_s0] sm:$0x3] }
  0x11   :  { %v82_v9 = vand.u32 4294901760, %v49_v6  ;;  %6709 = vmatprep.mubr.msk.f32.mxu1 %vm7804_vm0, %v8853_v10  ;;  %vm68_vm1 = vcmask 261120   ;;  %6742 = vmatprep.mubr.msk.f32.mxu0 %vm7804_vm0, %v8853_v10  ;;  %v558_v26 = vld [vmem:[%s8843_s1] sm:$0xff]  ;;  %v51_v34 = vld [vmem:[%s8846_s4 + $0x8] sm:$0xff]  ;;  %v52_v45 = vld [vmem:[%s8846_s4 + $0x10] sm:$0xff]  ;;  %vm1230_vm2 = vcmask 64512  }
  0x12   :  { %v7881_v11 = vpack.c.bf16 %v76_v5, %v73_v4  ;;  %v7883_v12 = vsub.f32 %v46_v0, %v73_v4  ;;  %v7885_v13 = vsub.f32 %v47_v1, %v76_v5  ;;  %v7887_v14 = vsub.f32 %v48_v2, %v79_v7  ;;  %v50_v33 = vld [vmem:[%s8846_s4] sm:$0xff]  ;;  %v559_v46 = vld [vmem:[%s8843_s1 + $0x8] sm:$0xff]  ;;  %v53_v47 = vld [vmem:[%s8846_s4 + $0x18] sm:$0xff]  ;;  %s6398_s19 = sld [smem:[#allocation2 + $0x1]] }
  0x13   :  { %v7889_v15 = vpack.c.bf16 %v82_v9, %v79_v7  ;;  %v7891_v16 = vsub.f32 %v49_v6, %v82_v9  ;;  %v70_v17 = vsel %vm68_vm1, %v63_v8, 0  ;;  %v567_v35 = vsel %vm68_vm1, %v558_v26, 0  ;;  %v560_v48 = vld [vmem:[%s8843_s1 + $0x10] sm:$0xff]  ;;  %v561_v57 = vld [vmem:[%s8843_s1 + $0x18] sm:$0xff] }
  0x14   :  { %7255 = vmatpush3.bf16.msra.mxu1 %v7881_v11  ;;  %7273 = vmatpush3.bf16.msra.mxu0 %v7881_v11  ;;  %v7896_v18 = vand.u32 4294901760, %v70_v17  ;;  %v154_v19 = vand.u32 4294901760, %v7883_v12  ;;  %v161_v20 = vand.u32 4294901760, %v7885_v13  ;;  %v168_v21 = vand.u32 4294901760, %v7887_v14 }
  0x15   :  { %7256 = vmatprep.subr.bf16.mxu1 %v8855_v3  ;;  %7274 = vmatprep.subr.bf16.mxu0 %v8855_v3  ;;  %v175_v22 = vand.u32 4294901760, %v7891_v16  ;;  %v7927_v40 = vand.u32 4294901760, %v567_v35  ;;  %v579_v43 = vand.u32 4294901760, %v50_v33  ;;  %v582_v44 = vand.u32 4294901760, %v51_v34 }
  0x16   :  { %v7905_v23 = vsub.f32 %v70_v17, %v7896_v18  ;;  %v155_v24 = vsub.f32 %v7883_v12, %v154_v19  ;;  %v162_v25 = vsub.f32 %v7885_v13, %v161_v20  ;;  %v169_v27 = vsub.f32 %v7887_v14, %v168_v21 }
  0x17   :  { %v176_v28 = vsub.f32 %v7891_v16, %v175_v22  ;;  %v7278_v32 = vpack.c.bf16 %v161_v20, %v154_v19  ;;  %v7281_v42 = vpack.c.bf16 %v175_v22, %v168_v21  ;;  %v585_v50 = vand.u32 4294901760, %v52_v45 }
  0x18   :  { %7258 = vmatpush3.bf16.msra.mxu1 %v7889_v15  ;;  %7276 = vmatpush3.bf16.msra.mxu0 %v7889_v15  ;;  %v143_v29 = vand.u32 4294901760, %v7905_v23  ;;  %v156_v30 = vand.u32 4294901760, %v155_v24  ;;  %v163_v31 = vand.u32 4294901760, %v162_v25  ;;  %v170_v38 = vand.u32 4294901760, %v169_v27 }
  0x19   :  { %7259 = vmatprep.subr.bf16.mxu1 %v8855_v3  ;;  %7277 = vmatprep.subr.bf16.mxu0 %v8855_v3  ;;  %v177_v39 = vand.u32 4294901760, %v176_v28  ;;  %v7947_v51 = vsub.f32 %v567_v35, %v7927_v40  ;;  %v570_v52 = vsel %vm68_vm1, %v559_v46, 0  ;;  %v588_v53 = vand.u32 4294901760, %v53_v47 }
  0x1a   :  { %v144_v36 = vsub.f32 %v7905_v23, %v143_v29  ;;  %v7260_v37 = vpack.c.bf16 %v163_v31, %v156_v30  ;;  %v7951_v54 = vsub.f32 %v50_v33, %v579_v43  ;;  %v7953_v55 = vsub.f32 %v51_v34, %v582_v44 }
  0x1b   :  { %6743 = vmatmul.mubr.f32.vlgmr.msra.gmra.mrb[0].mxu0 %v143_v29  ;;  %v7263_v49 = vpack.c.bf16 %v177_v39, %v170_v38  ;;  %v573_v56 = vsel %vm68_vm1, %v560_v48, 0  ;;  %v7960_v58 = vand.u32 4294901760, %v570_v52  ;;  %v7266_v59 = vpack.c.bf16 %v7885_v13, %v7883_v12 }
  0x1c   :  { %v145_v41 = vand.u32 4294901760, %v144_v36  ;;  %7279 = vmatpush3.bf16.msra.mxu0 %v7278_v32  ;;  %6753 = vmatprep.mubr.msk.f32.mxu0 %vm7804_vm0, %v8853_v10  ;;  %v649_v60 = vand.u32 4294901760, %v7947_v51  ;;  %v7966_v61 = vand.u32 4294901760, %v573_v56  ;;  %v576_v62 = vsel %vm68_vm1, %v561_v57, 0 }
  0x1d   :  { %7280 = vmatprep.subr.bf16.mxu0 %v8855_v3  ;;  %v690_v63 = vand.u32 4294901760, %v7951_v54  ;;  %v697_v0 = vand.u32 4294901760, %v7953_v55  ;;  %v7973_v1 = vsub.f32 %v52_v45, %v585_v50  ;;  %v7975_v2 = vsub.f32 %v53_v47, %v588_v53 }
  0x1e   :  { %6710 = vmatmul.mubr.f32.vlgmr.msra.gmra.mrb[0].mxu1 %v145_v41  ;;  %v7269_v4 = vpack.c.bf16 %v7891_v16, %v7887_v14  ;;  %v7984_v5 = vsub.f32 %v570_v52, %v7960_v58  ;;  %v7986_v6 = vand.u32 4294901760, %v576_v62  ;;  %v7990_v7 = vpack.c.bf16 %v582_v44, %v579_v43  ;;  %v60_v43 = vld [vmem:[%s8849_s7] sm:$0x7] }
  0x1f   :  { %7261 = vmatpush3.bf16.msra.mxu1 %v7260_v37  ;;  %6720 = vmatprep.mubr.msk.f32.mxu1 %vm7804_vm0, %v8853_v10  ;;  %v650_v8 = vsub.f32 %v7947_v51, %v649_v60  ;;  %v7996_v9 = vsub.f32 %v573_v56, %v7966_v61  ;;  %v698_v12 = vsub.f32 %v7953_v55, %v697_v0  ;;  %v704_v13 = vand.u32 4294901760, %v7973_v1  ;;  %v8069_v52 = vld [vmem:[%s8847_s5] sm:$0xff] }
  0x20   :  { %7262 = vmatprep.subr.bf16.mxu1 %v8855_v3  ;;  %7282 = vmatpush3.bf16.msra.mxu0 %v7281_v42  ;;  %v711_v14 = vand.u32 4294901760, %v7975_v2  ;;  %v659_v16 = vand.u32 4294901760, %v7984_v5  ;;  %v678_v17 = vsub.f32 %v576_v62, %v7986_v6  ;;  %v7305_v35 = vpack.c.bf16 %v7953_v55, %v7951_v54 }
  0x21   :  { %7283 = vmatprep.subr.bf16.mxu0 %v8855_v3  ;;  %v651_v19 = vand.u32 4294901760, %v650_v8  ;;  %v669_v20 = vand.u32 4294901760, %v7996_v9  ;;  %v699_v22 = vand.u32 4294901760, %v698_v12  ;;  %v705_v24 = vsub.f32 %v7973_v1, %v704_v13 }
  0x22   :  { %v712_v25 = vsub.f32 %v7975_v2, %v711_v14  ;;  %v660_v26 = vsub.f32 %v7984_v5, %v659_v16  ;;  %v679_v27 = vand.u32 4294901760, %v678_v17  ;;  %v7309_v36 = vpack.c.bf16 %v7975_v2, %v7973_v1 }
  0x23   :  { %7264 = vmatpush3.bf16.msra.mxu1 %v7263_v49  ;;  %6754 = vmatmul.mubr.f32.vlgmr.msra.gmra.mrb[0].mxu0 %v7896_v18  ;;  %v706_v29 = vand.u32 4294901760, %v705_v24  ;;  %v7321_v37 = vpack.c.bf16 %v697_v0, %v690_v63  ;;  %v7325_v38 = vpack.c.bf16 %v711_v14, %v704_v13  ;;  %v64_v39 = vlaneseq }
  0x24   :  { %7265 = vmatprep.subr.bf16.mxu1 %v8855_v3  ;;  %7285 = vmatpush3.bf16.msra.mxu0 %v7881_v11  ;;  %v691_v11 = vsub.f32 %v7951_v54, %v690_v63  ;;  %v713_v30 = vand.u32 4294901760, %v712_v25  ;;  %v661_v31 = vand.u32 4294901760, %v660_v26  ;;  %v680_v32 = vsub.f32 %v678_v17, %v679_v27 }
  0x25   :  { %7286 = vmatprep.subr.bf16.mxu0 %v8855_v3  ;;  %6764 = vmatprep.mubr.msk.f32.mxu0 %vm7804_vm0, %v8853_v10  ;;  %v8056_v41 = vshrl.u32 %v64_v39, 7  ;;  %vm3354_vm7 = vcmask 130048   ;;  %vm5886_vm8 = vcmask 1040384   ;;  %vm6381_vm9 = vcmask 254976  }
  0x26   :  { %6721 = vmatmul.mubr.f32.vlgmr.msra.gmra.mrb[0].mxu1 %v7896_v18  ;;  %v692_v21 = vand.u32 4294901760, %v691_v11  ;;  %v681_v34 = vand.u32 4294901760, %v680_v32 }
  0x27   :  { %7267 = vmatpush3.bf16.msra.mxu1 %v7266_v59  ;;  %6731 = vmatprep.mubr.msk.f32.mxu1 %vm7804_vm0, %v8853_v10  ;;  %v66_v42 = vsub.s32 0, %v8056_v41  ;;  %v1775_v56 = vsub.s32 5, %v8056_v41  ;;  %v8852_v59 = vsub.s32 2, %v8056_v41  ;;  %vm1211_vm3 = vcmp.lt.s32.totalorder %v8056_v41, 1 }
  0x28   :  { %7268 = vmatprep.subr.bf16.mxu1 %v8855_v3  ;;  %7288 = vmatpush3.bf16.msra.mxu0 %v7889_v15  ;;  %v8011_v15 = vpack.c.bf16 %v588_v53, %v585_v50  ;;  %v7297_v28 = vpack.c.bf16 %v699_v22, %v692_v21  ;;  %v8063_v50 = vsub.s32 1, %v8056_v41  ;;  %v8074_v53 = vld [vmem:[%s8847_s5 + $0x8] sm:$0x3]  ;;  %vm1199_vm4 = vcmp.ge.s32.totalorder %v8056_v41, 1  ;;  %s61_s5 = sld [smem:[#allocation2]] }
  0x29   :  { %v67_v44 = vrot.slane %v60_v43, %v66_v42  ;;  %v8086_v62 = vrot.slane %v8074_v53, %v66_v42  ;;  %v8099_v11 = vrot.slane %v8069_v52, %v8852_v59  ;;  %v8102_v12 = vadd.s32 8, %v8056_v41 }
  0x2a   :  { %vm1218_vm5 = vcmp.lt.s32.totalorder %v8056_v41, 7 }
  0x2b   :  { %7270 = vmatpush3.bf16.msra.mxu1 %v7269_v4  ;;  %6765 = vmatmul.mubr.f32.vlgmr.msra.gmra.mrb[0].mxu0 %v7896_v18  ;;  %v670_v18 = vsub.f32 %v7996_v9, %v669_v20  ;;  %vm1202_vm6 = vcmp.lt.s32.totalorder %v8102_v12, 15 }
  0x2c   :  { %7290 = vmatprep.subr.bf16.mxu1 %v7990_v7 }
  0x2d   :  { %v671_v33 = vand.u32 4294901760, %v670_v18 }
  0x2e   :  { %6732 = vmatmul.mubr.f32.vlgmr.msra.gmra.mrb[0].mxu1 %v7905_v23  ;;  %v7301_v23 = vpack.c.bf16 %v713_v30, %v706_v29 }
  0x2f   :  { %7292 = vmatpush3.bf16.msra.mxu1 %v7990_v7  ;;  %6775 = vmatprep.mubr.f32.mxu1 %v651_v19 }
  0x30   :  { %7294 = vmatprep.subr.bf16.mxu1 %v8011_v15 }
  0x33   :  { %7296 = vmatpush3.bf16.msra.mxu1 %v8011_v15 }
  0x34   :  { %7298 = vmatprep.subr.bf16.mxu1 %v7297_v28 }
  0x36   :  { %6776 = vmatmul.mubr.f32.vlgmr.msra.gmra.mrb[2].mxu1 %v661_v31 }
  0x37   :  { %7300 = vmatpush3.bf16.msra.mxu1 %v7297_v28  ;;  %6778 = vmatprep.mubr.f32.mxu1 %v671_v33 }
  0x38   :  { %7302 = vmatprep.subr.bf16.mxu1 %v7301_v23 }
  0x3a   :  { %6779 = vmatmul.mubr.f32.gmra.mrb[4].mxu1 %v681_v34 }
  0x3b   :  { %7304 = vmatpush3.bf16.msra.mxu1 %v7301_v23  ;;  %6789 = vmatprep.mubr.f32.mxu1 %v7927_v40 }
  0x3c   :  { %7306 = vmatprep.subr.bf16.mxu1 %v7305_v35 }
  0x3e   :  { %6790 = vmatmul.mubr.f32.vlgmr.msra.gmra.mrb[2].mxu1 %v7960_v58 }
  0x3f   :  { %7308 = vmatpush3.bf16.msra.mxu1 %v7305_v35  ;;  %6792 = vmatprep.mubr.f32.mxu1 %v7966_v61 }
  0x40   :  { %7310 = vmatprep.subr.bf16.mxu1 %v7309_v36 }
  0x42   :  { %6793 = vmatmul.mubr.f32.gmra.mrb[4].mxu1 %v7986_v6 }
  0x43   :  { %7312 = vmatpush3.bf16.msra.mxu1 %v7309_v36  ;;  %6803 = vmatprep.mubr.f32.mxu1 %v7947_v51  ;;  %v565_v51 = vrot.slane %v60_v43, %v8063_v50 }
  0x44   :  { %7314 = vmatprep.subr.bf16.mxu1 %v7990_v7 }
  0x46   :  { %6804 = vmatmul.mubr.f32.vlgmr.msra.gmra.mrb[2].mxu1 %v7984_v5  ;;  %v8091_v5 = vrot.slane %v8069_v52, %v1775_v56 }
  0x47   :  { %7316 = vmatpush3.bf16.msra.mxu1 %v7990_v7  ;;  %6806 = vmatprep.mubr.f32.mxu1 %v7996_v9 }
  0x48   :  { %7318 = vmatprep.subr.bf16.mxu1 %v8011_v15 }
  0x4a   :  { %6807 = vmatmul.mubr.f32.gmra.mrb[4].mxu1 %v678_v17  ;;  %v1761_v17 = vsub.s32 7, %v8056_v41 }
  0x4b   :  { %7320 = vmatpush3.bf16.msra.mxu1 %v8011_v15  ;;  %6817 = vmatprep.mubr.f32.mxu1 %v649_v60  ;;  %v8079_v60 = vrot.slane %v8069_v52, %v66_v42 }
  0x4c   :  { %7322 = vmatprep.subr.bf16.mxu1 %v7321_v37 }
  0x4e   :  { %6818 = vmatmul.mubr.f32.vlgmr.msra.gmra.mrb[2].mxu1 %v659_v16 }
  0x4f   :  { %7324 = vmatpush3.bf16.msra.mxu1 %v7321_v37  ;;  %6820 = vmatprep.mubr.f32.mxu1 %v669_v20 }
  0x50   :  { %7326 = vmatprep.subr.bf16.mxu1 %v7325_v38 }
  0x52   :  { %6821 = vmatmul.mubr.f32.gmra.mrb[4].mxu1 %v679_v27 }
  0x53   :  { %7328 = vmatpush3.bf16.msra.mxu1 %v7325_v38  ;;  %6831 = vmatprep.mubr.f32.mxu1 %v7927_v40 }
  0x54   :  { %7330 = vmatprep.subr.bf16.mxu1 %v7990_v7 }
  0x56   :  { %6832 = vmatmul.mubr.f32.vlgmr.msra.gmra.mrb[2].mxu1 %v7960_v58 }
  0x57   :  { %7332 = vmatpush3.bf16.msra.mxu1 %v7990_v7  ;;  %6834 = vmatprep.mubr.f32.mxu1 %v7966_v61 }
  0x58   :  { %7334 = vmatprep.subr.bf16.mxu1 %v8011_v15 }
  0x5a   :  { %6835 = vmatmul.mubr.f32.gmra.mrb[4].mxu1 %v7986_v6 }
  0x5b   :  { %7336 = vmatpush3.bf16.msra.mxu1 %v8011_v15  ;;  %6845 = vmatprep.mubr.f32.mxu1 %v7927_v40 }
  0x5e   :  { %6846 = vmatmul.mubr.f32.vlgmr.msra.gmra.mrb[2].mxu1 %v7960_v58 }
  0x5f   :  { %6848 = vmatprep.mubr.f32.mxu1 %v7966_v61  ;;  %v8083_v61 = vrot.slane %v8069_v52, %v8063_v50 }
  0x62   :  { %6849 = vmatmul.mubr.f32.gmra.mrb[4].mxu1 %v7986_v6  ;;  %v1753_v6 = vsub.s32 4, %v8056_v41 }
  0xfe   :  { %v553_v45 = vpop.f32.mrb[0].mxu0 }
  0xff   :  { %v6766_v46 = vpop.f32.mrb[1].mxu0 }
 0x101   :  { %v318_v47 = vpop.f32.mrb[0].mxu1 }
 0x102   :  { %v7565_v40 = vadd.f32 %v318_v47, %v67_v44  ;;  %v6733_v48 = vpop.f32.mrb[1].mxu1 }
 0x104   :  { %v7566_v49 = vadd.f32 %v7565_v40, %v553_v45 }
 0x106   :  { %v557_v54 = vmax.f32 %v7566_v49, 0.0 }
 0x108   :  { %v1206_v0 = vrot.slane %v557_v54, %v66_v42  ;;  %v3570_v13 = vrot.slane %v557_v54, %v8063_v50 }
 0x131   :  { %v6847_v55 = vpop.f32.mrb[2].mxu1 }
 0x132   :  { %v7567_v57 = vadd.f32 %v6847_v55, %v565_v51  ;;  %v1170_v58 = vpop.f32.mrb[3].mxu1 }
 0x133   :  { %v7568_v63 = vadd.f32 %v1170_v58, %v565_v51 }
 0x134   :  { %v1193_v1 = vmax.f32 %v7567_v57, 0.0 }
 0x135   :  { %v1192_v2 = vmax.f32 %v7568_v63, 0.0  ;;  %v6850_v4 = vpop.f32.mrb[4].mxu1 }
 0x136   :  { %v8094_v7 = vadd.f32 %v1206_v0, %v1193_v1  ;;  %v7569_v8 = vadd.f32 %v6850_v4, %v565_v51  ;;  %v1182_v9 = vpop.f32.mrb[5].mxu1 }
 0x137   :  { %v8105_v14 = vadd.f32 %v1206_v0, %v1192_v2  ;;  %v7570_v16 = vadd.f32 %v1182_v9, %v565_v51 }
 0x138   :  { %v1241_v15 = vsel %vm1230_vm2, %v8094_v7, 0  ;;  %v1195_v19 = vmax.f32 %v7569_v8, 0.0  ;;  %v1228_v20 = vmul.f32 %v8079_v60, %v8094_v7  ;;  %v1210_v21 = vrot.slane %v8094_v7, 7 }
 0x139   :  { %v1247_v22 = vand.u32 4294901760, %v1241_v15  ;;  %v1238_v24 = vsel %vm1230_vm2, %v8105_v14, 0  ;;  %v1194_v25 = vmax.f32 %v7570_v16, 0.0  ;;  %v1227_v26 = vmul.f32 %v8079_v60, %v8105_v14 }
 0x13a   :  { %v1244_v27 = vand.u32 4294901760, %v1238_v24  ;;  %v8118_v18 = vadd.f32 %v3570_v13, %v1195_v19  ;;  %v1235_v28 = vsel %vm1230_vm2, %v1228_v20, 0  ;;  %v1209_v29 = vrot.slane %v8105_v14, 7 }
 0x13b   :  { %v8123_v30 = vadd.f32 %v3570_v13, %v1194_v25  ;;  %v1232_v31 = vsel %vm1230_vm2, %v1227_v26, 0  ;;  %v1339_v32 = vsub.f32 %v1241_v15, %v1247_v22  ;;  %v8126_v33 = vand.u32 4294901760, %v1235_v28 }
 0x13c   :  { %v8128_v23 = vpack.c.bf16 %v1247_v22, %v1244_v27  ;;  %v3597_v34 = vsel %vm1230_vm2, %v8118_v18, 0  ;;  %v8132_v35 = vand.u32 4294901760, %v1232_v31  ;;  %v1332_v36 = vsub.f32 %v1238_v24, %v1244_v27 }
 0x13d   :  { %v3603_v37 = vand.u32 4294901760, %v3597_v34  ;;  %v3594_v38 = vsel %vm1230_vm2, %v8123_v30, 0  ;;  %v1340_v39 = vand.u32 4294901760, %v1339_v32  ;;  %v8137_v42 = vsub.f32 %v1235_v28, %v8126_v33 }
 0x13e   :  { %v3600_v43 = vand.u32 4294901760, %v3594_v38  ;;  %7338 = vmatprep.subr.bf16.mxu0 %v8128_v23  ;;  %7362 = vmatprep.subr.bf16.mxu1 %v8128_v23  ;;  %v8142_v44 = vsub.f32 %v1232_v31, %v8132_v35  ;;  %v1333_v45 = vand.u32 4294901760, %v1332_v36  ;;  %v8144_v46 = vpack.c.bf16 %v1339_v32, %v1332_v36 }
 0x13f   :  { %7340 = vmatpush3.bf16.xpose.msra.mxu0 %v8128_v23  ;;  %7364 = vmatpush3.bf16.xpose.msra.mxu1 %v8128_v23  ;;  %v1341_v47 = vsub.f32 %v1339_v32, %v1340_v39  ;;  %v1322_v40 = vand.u32 4294901760, %v8137_v42  ;;  %v1213_v48 = vsel %vm1211_vm3, %v1210_v21, %v1209_v29  ;;  %v1216_v49 = vrot.slane %v8105_v14, 1 }
 0x140   :  { %v8152_v51 = vpack.c.bf16 %v3603_v37, %v3600_v43  ;;  %v1312_v54 = vand.u32 4294901760, %v8142_v44  ;;  %v1334_v55 = vsub.f32 %v1332_v36, %v1333_v45  ;;  %v8157_v56 = vsel %vm1199_vm4, %v1213_v48, 0.0 }
 0x141   :  { %v1342_v57 = vand.u32 4294901760, %v1341_v47  ;;  %v1323_v58 = vsub.f32 %v8137_v42, %v1322_v40  ;;  %v1217_v63 = vrot.slane %v8094_v7, 1  ;;  %v1771_v0 = vmul.f32 %v8099_v11, %v8157_v56 }
 0x142   :  { %v1313_v1 = vsub.f32 %v8142_v44, %v1312_v54  ;;  %v1335_v2 = vand.u32 4294901760, %v1334_v55  ;;  %v1777_v4 = vmul.f32 %v8091_v5, %v8105_v14  ;;  %v8172_v8 = vsel %vm1211_vm3, %v1209_v29, %v1210_v21 }
 0x143   :  { %v1324_v9 = vand.u32 4294901760, %v1323_v58  ;;  %v8176_v13 = vsel %vm1218_vm5, %v1216_v49, %v1217_v63  ;;  %v1220_v16 = vsel %vm1218_vm5, %v1217_v63, %v1216_v49  ;;  %v1772_v15 = vmul.f32 %v8099_v11, %v8172_v8 }
 0x144   :  { %v1314_v19 = vand.u32 4294901760, %v1313_v1  ;;  %v8182_v20 = vpack.c.bf16 %v1342_v57, %v1335_v2  ;;  %v1779_v22 = vadd.f32 %v1777_v4, %v1771_v0  ;;  %v1785_v24 = vmul.f32 %v8086_v62, %v8176_v13 }
 0x145   :  { %v8188_v21 = vsel %vm1202_vm6, %v1220_v16, 0.0  ;;  %v1778_v25 = vmul.f32 %v8091_v5, %v8094_v7  ;;  %v8192_v26 = vpack.c.bf16 %v1340_v39, %v1333_v45  ;;  %v2326_v27 = vsel %vm1230_vm2, %v8157_v56, 0 }
 0x146   :  { %6855 = vmatprep.mubr.f32.mxu0 %v1314_v19  ;;  %7342 = vmatprep.subr.bf16.mxu0 %v8182_v20  ;;  %v1787_v28 = vadd.f32 %v1785_v24, %v1779_v22  ;;  %v1786_v29 = vmul.f32 %v8086_v62, %v8188_v21  ;;  %v2329_v31 = vsel %vm1230_vm2, %v8172_v8, 0  ;;  %v2332_v32 = vand.u32 4294901760, %v2326_v27 }
 0x147   :  { %7366 = vmatprep.subr.bf16.mxu1 %v8182_v20  ;;  %6856 = vmatmul.mubr.f32.vlgmr.msra.gmra.mrb[2].mxu0 %v1324_v9  ;;  %v1780_v36 = vadd.f32 %v1778_v25, %v1772_v15  ;;  %v2335_v39 = vand.u32 4294901760, %v2329_v31  ;;  %v3688_v45 = vsub.f32 %v3594_v38, %v3600_v43  ;;  %v8205_v47 = vrot.slane %v8069_v52, %v1753_v6 }
 0x148   :  { %7344 = vmatpush3.bf16.xpose.msra.mxu0 %v8182_v20  ;;  %6862 = vmatprep.mubr.f32.mxu0 %v8132_v35  ;;  %v1812_v48 = vsel %vm1230_vm2, %v1787_v28, 0  ;;  %v3695_v49 = vsub.f32 %v3597_v34, %v3603_v37  ;;  %v8213_v55 = vrot.slane %v8069_v52, %v1761_v17  ;;  %v1749_v6 = vmul.f32 %v8083_v61, %v8157_v56 }
 0x149   :  { %7346 = vmatprep.subr.bf16.mxu0 %v8144_v46  ;;  %v8216_v38 = vand.u32 4294901760, %v1812_v48  ;;  %v1788_v43 = vadd.f32 %v1786_v29, %v1780_v36  ;;  %v8218_v57 = vpack.c.bf16 %v2335_v39, %v2332_v32  ;;  %v3689_v58 = vand.u32 4294901760, %v3688_v45 }
 0x14a   :  { %v3696_v63 = vand.u32 4294901760, %v3695_v49  ;;  %v1755_v17 = vmul.f32 %v8205_v47, %v8105_v14  ;;  %v1763_v16 = vmul.f32 %v8213_v55, %v8176_v13  ;;  %v2420_v28 = vsub.f32 %v2326_v27, %v2332_v32 }
 0x14b   :  { %v8223_v0 = vsub.f32 %v1812_v48, %v8216_v38  ;;  %v1815_v34 = vsel %vm1230_vm2, %v1788_v43, 0  ;;  %v3690_v1 = vsub.f32 %v3688_v45, %v3689_v58  ;;  %v2427_v48 = vsub.f32 %v2329_v31, %v2335_v39 }
 0x14c   :  { %v8228_v37 = vand.u32 4294901760, %v1815_v34  ;;  %v3697_v2 = vsub.f32 %v3695_v49, %v3696_v63  ;;  %v1757_v9 = vadd.f32 %v1755_v17, %v1749_v6  ;;  %v2421_v6 = vand.u32 4294901760, %v2420_v28 }
 0x14d   :  { %v1886_v4 = vand.u32 4294901760, %v8223_v0  ;;  %v3691_v19 = vand.u32 4294901760, %v3690_v1  ;;  %v2428_v17 = vand.u32 4294901760, %v2427_v48  ;;  %v8251_v32 = vpack.c.bf16 %v3695_v49, %v3688_v45 }
 0x14e   :  { %v8234_v15 = vsub.f32 %v1815_v34, %v8228_v37  ;;  %v3698_v22 = vand.u32 4294901760, %v3697_v2  ;;  %v8240_v25 = vadd.f32 %v1763_v16, %v1757_v9  ;;  %v2422_v27 = vsub.f32 %v2420_v28, %v2421_v6 }
 0x14f   :  { %v1887_v24 = vsub.f32 %v8223_v0, %v1886_v4  ;;  %6863 = vmatmul.mubr.f32.vlgmr.msra.gmra.mrb[2].mxu0 %v8126_v33  ;;  %v1750_v1 = vmul.f32 %v8083_v61, %v8172_v8  ;;  %v1797_v2 = vsub.s32 6, %v8056_v41  ;;  %v2429_v31 = vsub.f32 %v2427_v48, %v2428_v17 }
 0x150   :  { %7348 = vmatpush3.bf16.xpose.msra.mxu0 %v8144_v46  ;;  %v8857_v29 = vand.u32 4294901760, %v8234_v15  ;;  %6869 = vmatprep.mubr.f32.mxu0 %v8142_v44  ;;  %v8245_v36 = vpack.c.bf16 %v3698_v22, %v3691_v19  ;;  %v1756_v39 = vmul.f32 %v8205_v47, %v8094_v7  ;;  %v1791_v16 = vsub.s32 3, %v8056_v41 }
 0x151   :  { %v1888_v43 = vand.u32 4294901760, %v1887_v24  ;;  %7350 = vmatprep.subr.bf16.mxu0 %v8128_v23  ;;  %v2423_v19 = vand.u32 4294901760, %v2422_v27  ;;  %v1764_v22 = vmul.f32 %v8213_v55, %v8188_v21  ;;  %v8261_v24 = vpack.c.bf16 %v2427_v48, %v2420_v28 }
 0x152   :  { %v1897_v34 = vsub.f32 %v8234_v15, %v8857_v29  ;;  %v8263_v45 = vpack.c.bf16 %v3696_v63, %v3689_v58  ;;  %v3585_v49 = vmul.f32 %v8123_v30, %v8079_v60  ;;  %v8267_v59 = vpack.c.bf16 %v2428_v17, %v2421_v6 }
 0x153   :  { %6897 = vmatprep.mubr.f32.mxu1 %v1888_v43  ;;  %v2430_v43 = vand.u32 4294901760, %v2429_v31  ;;  %v3573_v27 = vrot.slane %v8123_v30, 7  ;;  %v3574_v10 = vrot.slane %v8118_v18, 7  ;;  %v3579_v28 = vrot.slane %v8123_v30, 1 }
 0x154   :  { %v1898_v9 = vand.u32 4294901760, %v1897_v34  ;;  %v1758_v34 = vadd.f32 %v1756_v39, %v1750_v1  ;;  %v3580_v58 = vrot.slane %v8118_v18, 1  ;;  %v8284_v6 = vrot.slane %v8069_v52, %v1791_v16 }
 0x155   :  { %v8277_v63 = vpack.c.bf16 %v2430_v43, %v2423_v19  ;;  %v3576_v17 = vsel %vm1211_vm3, %v3574_v10, %v3573_v27  ;;  %v2843_v31 = vsel %vm1230_vm2, %v8188_v21, 0  ;;  %v8301_v39 = vrot.slane %v8074_v53, %v8063_v50 }
 0x156   :  { %6898 = vmatmul.mubr.f32.vlgmr.msra.gmra.mrb[6].mxu1 %v1898_v9  ;;  %v8279_v48 = vadd.f32 %v1764_v22, %v1758_v34  ;;  %v8293_v1 = vsel %vm1218_vm5, %v3579_v28, %v3580_v58  ;;  %v4113_v9 = vmul.f32 %v8123_v30, %v8091_v5  ;;  %v8306_v44 = vsel %vm1199_vm4, %v3576_v17, 0.0 }
 0x157   :  { %7368 = vmatpush3.bf16.xpose.msra.mxu1 %v8182_v20  ;;  %6904 = vmatprep.mubr.f32.mxu1 %v8216_v38  ;;  %v2840_v20 = vsel %vm1230_vm2, %v8176_v13, 0  ;;  %v8311_v16 = vrot.slane %v8069_v52, %v1797_v2  ;;  %v3588_v19 = vsel %vm1230_vm2, %v3585_v49, 0  ;;  %v4111_v22 = vmul.f32 %v8306_v44, %v8099_v11 }
 0x158   :  { %7370 = vmatprep.subr.bf16.mxu1 %v8144_v46  ;;  %6870 = vmatmul.mubr.f32.vlgmr.msra.gmra.mrb[2].mxu0 %v8137_v42  ;;  %v2846_v43 = vand.u32 4294901760, %v2840_v20  ;;  %v2849_v50 = vand.u32 4294901760, %v2843_v31  ;;  %v8318_v53 = vsel %vm1211_vm3, %v3573_v27, %v3574_v10  ;;  %v3582_v34 = vsel %vm1218_vm5, %v3580_v58, %v3579_v28 }
 0x159   :  { %7352 = vmatpush3.bf16.xpose.msra.mxu0 %v8128_v23  ;;  %6876 = vmatprep.mubr.f32.mxu0 %v1312_v54  ;;  %v4117_v54 = vmul.f32 %v8293_v1, %v8086_v62  ;;  %v4114_v17 = vmul.f32 %v8118_v18, %v8091_v5  ;;  %v1793_v52 = vmul.f32 %v8284_v6, %v8157_v56  ;;  %v8332_v29 = vsel %vm1202_vm6, %v3582_v34, 0.0 }
 0x15a   :  { %7354 = vmatprep.subr.bf16.mxu0 %v8192_v26  ;;  %v3586_v2 = vmul.f32 %v8118_v18, %v8079_v60  ;;  %v4115_v49 = vadd.f32 %v4113_v9, %v4111_v22  ;;  %v8328_v3 = vpack.c.bf16 %v2849_v50, %v2846_v43  ;;  %v4112_v10 = vmul.f32 %v8318_v53, %v8099_v11 }
 0x15b   :  { %v4118_v5 = vmul.f32 %v8332_v29, %v8086_v62  ;;  %v1799_v56 = vmul.f32 %v8311_v16, %v8105_v14  ;;  %v1807_v60 = vmul.f32 %v8301_v39, %v8176_v13  ;;  %v8345_v12 = vand.u32 4294901760, %v3588_v19 }
 0x15c   :  { %v8347_v27 = vadd.f32 %v4117_v54, %v4115_v49  ;;  %v2934_v28 = vsub.f32 %v2840_v20, %v2846_v43  ;;  %v2941_v58 = vsub.f32 %v2843_v31, %v2849_v50  ;;  %v4116_v62 = vadd.f32 %v4114_v17, %v4112_v10 }
 0x15d   :  { %v1801_v11 = vadd.f32 %v1799_v56, %v1793_v52  ;;  %v1794_v14 = vmul.f32 %v8284_v6, %v8172_v8  ;;  %v3591_v20 = vsel %vm1230_vm2, %v3586_v2, 0  ;;  %v1800_v42 = vmul.f32 %v8311_v16, %v8094_v7 }
 0x15e   :  { %6905 = vmatmul.mubr.f32.vlgmr.msra.gmra.mrb[6].mxu1 %v8228_v37  ;;  %v2942_v13 = vand.u32 4294901760, %v2941_v58  ;;  %v8358_v9 = vadd.f32 %v4118_v5, %v4116_v62  ;;  %v1808_v22 = vmul.f32 %v8301_v39, %v8188_v21  ;;  %v8369_v50 = vand.u32 4294901760, %v3591_v20 }
 0x15f   :  { %7372 = vmatpush3.bf16.xpose.msra.mxu1 %v8144_v46  ;;  %6911 = vmatprep.mubr.f32.mxu1 %v8223_v0  ;;  %v2935_v46 = vand.u32 4294901760, %v2934_v28  ;;  %v8360_v31 = vadd.f32 %v1807_v60, %v1801_v11  ;;  %v1802_v43 = vadd.f32 %v1800_v42, %v1794_v14  ;;  %v4646_v52 = vsel %vm1230_vm2, %v8306_v44, 0 }
 0x160   :  { %7374 = vmatprep.subr.bf16.mxu1 %v8128_v23  ;;  %6877 = vmatmul.mubr.f32.vlgmr.msra.gmra.mrb[2].mxu0 %v1322_v40  ;;  %v8365_v40 = vsub.f32 %v3588_v19, %v8345_v12  ;;  %v2943_v54 = vsub.f32 %v2941_v58, %v2942_v13  ;;  %v8376_v7 = vpack.c.bf16 %v2941_v58, %v2934_v28  ;;  %v4649_v10 = vsel %vm1230_vm2, %v8318_v53, 0 }
 0x161   :  { %7356 = vmatpush3.bf16.xpose.msra.mxu0 %v8192_v26  ;;  %6883 = vmatprep.mubr.f32.mxu0 %v8132_v35  ;;  %v2936_v8 = vsub.f32 %v2934_v28, %v2935_v46  ;;  %v8374_v2 = vadd.f32 %v1808_v22, %v1802_v43  ;;  %v8378_v19 = vpack.c.bf16 %v2942_v13, %v2935_v46  ;;  %v4652_v5 = vand.u32 4294901760, %v4646_v52 }
 0x162   :  { %7358 = vmatprep.subr.bf16.mxu0 %v8128_v23  ;;  %v2944_v17 = vand.u32 4294901760, %v2943_v54  ;;  %v3668_v21 = vand.u32 4294901760, %v8365_v40  ;;  %v4655_v56 = vand.u32 4294901760, %v4649_v10  ;;  %v8393_v0 = vsub.f32 %v3591_v20, %v8369_v50 }
 0x163   :  { %v2937_v34 = vand.u32 4294901760, %v2936_v8  ;;  %v2320_v60 = vsel %vm1230_vm2, %v8240_v25, 0  ;;  %v4103_v58 = vmul.f32 %v8123_v30, %v8205_v47  ;;  %v4107_v62 = vmul.f32 %v8293_v1, %v8213_v55 }
 0x164   :  { %v8400_v28 = vpack.c.bf16 %v4655_v56, %v4652_v5  ;;  %v4740_v11 = vsub.f32 %v4646_v52, %v4652_v5  ;;  %v4747_v46 = vsub.f32 %v4649_v10, %v4655_v56  ;;  %v4102_v13 = vmul.f32 %v8318_v53, %v8083_v61 }
 0x165   :  { %v8384_v49 = vpack.c.bf16 %v2944_v17, %v2937_v34  ;;  %v4104_v25 = vmul.f32 %v8118_v18, %v8205_v47  ;;  %v3678_v20 = vand.u32 4294901760, %v8393_v0  ;;  %v8414_v42 = vand.u32 4294901760, %v2320_v60 }
 0x166   :  { %6912 = vmatmul.mubr.f32.vlgmr.msra.gmra.mrb[6].mxu1 %v8234_v15  ;;  %v4741_v8 = vand.u32 4294901760, %v4740_v11  ;;  %v8858_v54 = vand.u32 4294901760, %v8234_v15  ;;  %v4748_v43 = vand.u32 4294901760, %v4747_v46  ;;  %v4108_v17 = vmul.f32 %v8332_v29, %v8213_v55 }
 0x167   :  { %7376 = vmatpush3.bf16.xpose.msra.mxu1 %v8128_v23  ;;  %6918 = vmatprep.mubr.f32.mxu1 %v1886_v4  ;;  %v4101_v4 = vmul.f32 %v8306_v44, %v8083_v61  ;;  %v4106_v34 = vadd.f32 %v4104_v25, %v4102_v13  ;;  %v8424_v52 = vpack.c.bf16 %v4747_v46, %v4740_v11  ;;  %v5160_v10 = vsel %vm1230_vm2, %v8293_v1, 0 }
 0x168   :  { %7378 = vmatprep.subr.bf16.mxu1 %v8192_v26  ;;  %6884 = vmatmul.mubr.f32.vlgmr.msra.gmra.mrb[2].mxu0 %v8126_v33  ;;  %v4742_v47 = vsub.f32 %v4740_v11, %v4741_v8  ;;  %v2323_v15 = vsel %vm1230_vm2, %v8279_v48, 0  ;;  %v4749_v5 = vsub.f32 %v4747_v46, %v4748_v43  ;;  %v3679_v56 = vsub.f32 %v8393_v0, %v3678_v20 }
 0x169   :  { %7360 = vmatpush3.bf16.xpose.msra.mxu0 %v8128_v23  ;;  %6890 = vmatprep.mubr.f32.mxu0 %v8132_v35  ;;  %v3669_v35 = vsub.f32 %v8365_v40, %v3668_v21  ;;  %v4105_v14 = vadd.f32 %v4103_v58, %v4101_v4  ;;  %v8432_v55 = vadd.f32 %v4108_v17, %v4106_v34  ;;  %v8446_v11 = vand.u32 4294901760, %v2323_v15 }
 0x16a   :  { %7434 = vmatprep.subr.bf16.mxu0 %v8152_v51  ;;  %v8441_v4 = vsub.f32 %v2320_v60, %v8414_v42  ;;  %v4743_v58 = vand.u32 4294901760, %v4742_v47  ;;  %v4750_v48 = vand.u32 4294901760, %v4749_v5  ;;  %v4123_v46 = vmul.f32 %v8123_v30, %v8311_v16 }
 0x16b   :  { %v8418_v22 = vadd.f32 %v4107_v62, %v4105_v14  ;;  %v3670_v61 = vand.u32 4294901760, %v3669_v35  ;;  %v5166_v62 = vand.u32 4294901760, %v5160_v10  ;;  %v4121_v14 = vmul.f32 %v8306_v44, %v8284_v6 }
 0x16c   :  { %v8452_v13 = vpack.c.bf16 %v4750_v48, %v4743_v58  ;;  %v4127_v25 = vmul.f32 %v8293_v1, %v8301_v39  ;;  %v4122_v44 = vmul.f32 %v8318_v53, %v8284_v6  ;;  %v4124_v30 = vmul.f32 %v8118_v18, %v8311_v16 }
 0x16d   :  { %v4125_v34 = vadd.f32 %v4123_v46, %v4121_v14  ;;  %v4128_v47 = vmul.f32 %v8332_v29, %v8301_v39  ;;  %v8469_v1 = vsub.f32 %v2323_v15, %v8446_v11 }
 0x16e   :  { %6919 = vmatmul.mubr.f32.vlgmr.msra.gmra.mrb[6].mxu1 %v8858_v54  ;;  %v3680_v54 = vand.u32 4294901760, %v3679_v56  ;;  %v4126_v53 = vadd.f32 %v4124_v30, %v4122_v44  ;;  %v8860_v44 = vmov 0.0  }
 0x16f   :  { %7380 = vmatpush3.bf16.xpose.msra.mxu1 %v8192_v26  ;;  %6925 = vmatprep.mubr.f32.mxu1 %v8216_v38  ;;  %v8434_v26 = vpack.c.bf16 %v4748_v43, %v4741_v8  ;;  %v5254_v8 = vsub.f32 %v5160_v10, %v5166_v62  ;;  %v2400_v43 = vand.u32 4294901760, %v8441_v4  ;;  %v8471_v10 = vadd.f32 %v4127_v25, %v4125_v34 }
 0x170   :  { %7382 = vmatprep.subr.bf16.mxu1 %v8128_v23  ;;  %6891 = vmatmul.mubr.f32.vlgmr.msra.gmra.mrb[2].mxu0 %v8126_v33  ;;  %v5163_v33 = vsel %vm1230_vm2, %v8332_v29, 0  ;;  %v8480_v29 = vadd.f32 %v4128_v47, %v4126_v53  ;;  %v2410_v15 = vand.u32 4294901760, %v8469_v1 }
 0x171   :  { %7436 = vmatpush3.bf16.xpose.msra.mxu0 %v8152_v51  ;;  %7023 = vmatprep.mubr.f32.mxu0 %v3670_v61  ;;  %v5169_v35 = vand.u32 4294901760, %v5163_v33  ;;  %v5255_v61 = vand.u32 4294901760, %v5254_v8  ;;  %v2401_v18 = vsub.f32 %v8441_v4, %v2400_v43 }
 0x172   :  { %7438 = vmatprep.subr.bf16.mxu0 %v8245_v36  ;;  %v2411_v48 = vsub.f32 %v8469_v1, %v2410_v15  ;;  %v5157_v30 = vsel %vm1230_vm2, %v8480_v29, 0 }
 0x173   :  { %v8454_v60 = vpack.c.bf16 %v5169_v35, %v5166_v62  ;;  %v5261_v17 = vsub.f32 %v5163_v33, %v5169_v35  ;;  %v5256_v6 = vsub.f32 %v5254_v8, %v5255_v61  ;;  %v2402_v58 = vand.u32 4294901760, %v2401_v18 }
 0x174   :  { %v2412_v62 = vand.u32 4294901760, %v2411_v48  ;;  %v5242_v47 = vand.u32 4294901760, %v5157_v30 }
 0x175   :  { %v5262_v5 = vand.u32 4294901760, %v5261_v17  ;;  %v8474_v56 = vpack.c.bf16 %v5261_v17, %v5254_v8 }
 0x176   :  { %6926 = vmatmul.mubr.f32.vlgmr.msra.gmra.mrb[6].mxu1 %v8228_v37 }
 0x177   :  { %7384 = vmatpush3.bf16.xpose.msra.mxu1 %v8128_v23  ;;  %6932 = vmatprep.mubr.f32.mxu1 %v8216_v38  ;;  %v5263_v23 = vsub.f32 %v5261_v17, %v5262_v5  ;;  %v5257_v38 = vand.u32 4294901760, %v5256_v6  ;;  %v8482_v39 = vpack.c.bf16 %v5262_v5, %v5255_v61 }
 0x178   :  { %7386 = vmatprep.subr.bf16.mxu1 %v8218_v57  ;;  %7024 = vmatmul.mubr.f32.vlgmr.msra.gmra.mrb[4].mxu0 %v3680_v54 }
 0x179   :  { %7440 = vmatpush3.bf16.xpose.msra.mxu0 %v8245_v36  ;;  %7030 = vmatprep.mubr.f32.mxu0 %v8345_v12  ;;  %v5264_v16 = vand.u32 4294901760, %v5263_v23 }
 0x17a   :  { %7442 = vmatprep.subr.bf16.mxu0 %v8251_v32 }
 0x17b   :  { %v8485_v33 = vpack.c.bf16 %v5264_v16, %v5257_v38 }
 0x17e   :  { %6933 = vmatmul.mubr.f32.vlgmr.msra.gmra.mrb[6].mxu1 %v8228_v37  ;;  %v4132_v37 = vsel %vm1230_vm2, %v8347_v27, 0 }
 0x17f   :  { %7388 = vmatpush3.bf16.xpose.msra.mxu1 %v8218_v57  ;;  %6939 = vmatprep.mubr.f32.mxu1 %v2402_v58 }
 0x180   :  { %7390 = vmatprep.subr.bf16.mxu1 %v8277_v63  ;;  %7031 = vmatmul.mubr.f32.vlgmr.msra.gmra.mrb[4].mxu0 %v8369_v50 }
 0x181   :  { %7444 = vmatpush3.bf16.xpose.msra.mxu0 %v8251_v32  ;;  %7037 = vmatprep.mubr.f32.mxu0 %v8365_v40 }
 0x182   :  { %7446 = vmatprep.subr.bf16.mxu0 %v8152_v51 }
 0x186   :  { %6940 = vmatmul.mubr.f32.vlgmr.msra.gmra.mrb[6].mxu1 %v2412_v62 }
 0x187   :  { %7392 = vmatpush3.bf16.xpose.msra.mxu1 %v8277_v63  ;;  %6946 = vmatprep.mubr.f32.mxu1 %v8414_v42  ;;  %v8508_v63 = vand.u32 4294901760, %v4132_v37 }
 0x188   :  { %7394 = vmatprep.subr.bf16.mxu1 %v8261_v24  ;;  %7038 = vmatmul.mubr.f32.vlgmr.msra.gmra.mrb[4].mxu0 %v8393_v0  ;;  %v2834_v0 = vsel %vm1230_vm2, %v8360_v31, 0  ;;  %v2837_v31 = vsel %vm1230_vm2, %v8374_v2, 0 }
 0x189   :  { %7448 = vmatpush3.bf16.xpose.msra.mxu0 %v8152_v51  ;;  %7044 = vmatprep.mubr.f32.mxu0 %v3668_v21  ;;  %v4205_v27 = vsub.f32 %v4132_v37, %v8508_v63  ;;  %v8542_v25 = vand.u32 4294901760, %v2837_v31 }
 0x18a   :  { %7450 = vmatprep.subr.bf16.mxu0 %v8263_v45 }
 0x18b   :  { %v4206_v21 = vand.u32 4294901760, %v4205_v27 }
 0x18e   :  { %6947 = vmatmul.mubr.f32.vlgmr.msra.gmra.mrb[6].mxu1 %v8446_v11 }
 0x18f   :  { %7396 = vmatpush3.bf16.xpose.msra.mxu1 %v8261_v24  ;;  %6953 = vmatprep.mubr.f32.mxu1 %v8441_v4  ;;  %v4135_v24 = vsel %vm1230_vm2, %v8358_v9, 0  ;;  %v8531_v4 = vand.u32 4294901760, %v2834_v0 }
 0x190   :  { %7398 = vmatprep.subr.bf16.mxu1 %v8218_v57  ;;  %7045 = vmatmul.mubr.f32.vlgmr.msra.gmra.mrb[4].mxu0 %v3678_v20  ;;  %v8520_v40 = vand.u32 4294901760, %v4135_v24  ;;  %v4207_v20 = vsub.f32 %v4205_v27, %v4206_v21 }
 0x191   :  { %7452 = vmatpush3.bf16.xpose.msra.mxu0 %v8263_v45  ;;  %7051 = vmatprep.mubr.f32.mxu0 %v8345_v12 }
 0x192   :  { %7454 = vmatprep.subr.bf16.mxu0 %v8152_v51  ;;  %v4215_v9 = vsub.f32 %v4135_v24, %v8520_v40  ;;  %v4208_v14 = vand.u32 4294901760, %v4207_v20 }
 0x194   :  { %v4216_v35 = vand.u32 4294901760, %v4215_v9 }
 0x196   :  { %6954 = vmatmul.mubr.f32.vlgmr.msra.gmra.mrb[6].mxu1 %v8469_v1  ;;  %v4217_v46 = vsub.f32 %v4215_v9, %v4216_v35 }
 0x197   :  { %7400 = vmatpush3.bf16.xpose.msra.mxu1 %v8218_v57  ;;  %6960 = vmatprep.mubr.f32.mxu1 %v2400_v43 }
 0x198   :  { %7402 = vmatprep.subr.bf16.mxu1 %v8267_v59  ;;  %7052 = vmatmul.mubr.f32.vlgmr.msra.gmra.mrb[4].mxu0 %v8369_v50  ;;  %v4218_v8 = vand.u32 4294901760, %v4217_v46 }
 0x199   :  { %7456 = vmatpush3.bf16.xpose.msra.mxu0 %v8152_v51  ;;  %7058 = vmatprep.mubr.f32.mxu0 %v8345_v12  ;;  %v2913_v12 = vsub.f32 %v2834_v0, %v8531_v4 }
 0x19a   :  { %7458 = vmatprep.subr.bf16.mxu0 %v8152_v51 }
 0x19e   :  { %6961 = vmatmul.mubr.f32.vlgmr.msra.gmra.mrb[6].mxu1 %v2410_v15 }
 0x19f   :  { %7404 = vmatpush3.bf16.xpose.msra.mxu1 %v8267_v59  ;;  %6967 = vmatprep.mubr.f32.mxu1 %v8414_v42  ;;  %v2914_v59 = vand.u32 4294901760, %v2913_v12 }
 0x1a0   :  { %7406 = vmatprep.subr.bf16.mxu1 %v8218_v57  ;;  %7059 = vmatmul.mubr.f32.vlgmr.msra.gmra.mrb[4].mxu0 %v8369_v50  ;;  %v2923_v50 = vsub.f32 %v2837_v31, %v8542_v25 }
 0x1a1   :  { %7460 = vmatpush3.bf16.xpose.msra.mxu0 %v8152_v51  ;;  %7065 = vmatprep.mubr.f32.mxu0 %v4208_v14  ;;  %v2915_v2 = vsub.f32 %v2913_v12, %v2914_v59  ;;  %v3349_v14 = vstv %s6398_s19 }
 0x1a2   :  { %7462 = vmatprep.subr.bf16.mxu0 %v8245_v36  ;;  %v2924_v54 = vand.u32 4294901760, %v2923_v50 }
 0x1a3   :  { %v2916_v43 = vand.u32 4294901760, %v2915_v2 }
 0x1a6   :  { %6968 = vmatmul.mubr.f32.vlgmr.msra.gmra.mrb[6].mxu1 %v8446_v11 }
 0x1a7   :  { %7408 = vmatpush3.bf16.xpose.msra.mxu1 %v8218_v57  ;;  %6974 = vmatprep.mubr.f32.mxu1 %v8414_v42  ;;  %v2925_v57 = vsub.f32 %v2923_v50, %v2924_v54 }
 0x1a8   :  { %7410 = vmatprep.subr.bf16.mxu1 %v8328_v3  ;;  %7066 = vmatmul.mubr.f32.vlgmr.msra.gmra.mrb[6].mxu0 %v4218_v8 }
 0x1a9   :  { %7464 = vmatpush3.bf16.xpose.msra.mxu0 %v8245_v36  ;;  %7072 = vmatprep.mubr.f32.mxu0 %v8508_v63  ;;  %v2926_v36 = vand.u32 4294901760, %v2925_v57 }
 0x1aa   :  { %7466 = vmatprep.subr.bf16.mxu0 %v8251_v32 }
 0x1ae   :  { %6975 = vmatmul.mubr.f32.vlgmr.msra.gmra.mrb[6].mxu1 %v8446_v11  ;;  %v4643_v11 = vsel %vm1230_vm2, %v8432_v55, 0 }
 0x1af   :  { %7412 = vmatpush3.bf16.xpose.msra.mxu1 %v8328_v3  ;;  %6981 = vmatprep.mubr.f32.mxu1 %v2916_v43 }
 0x1b0   :  { %7414 = vmatprep.subr.bf16.mxu1 %v8384_v49  ;;  %7073 = vmatmul.mubr.f32.vlgmr.msra.gmra.mrb[6].mxu0 %v8520_v40 }
 0x1b1   :  { %7468 = vmatpush3.bf16.xpose.msra.mxu0 %v8251_v32  ;;  %7079 = vmatprep.mubr.f32.mxu0 %v4205_v27  ;;  %v4640_v32 = vsel %vm1230_vm2, %v8418_v22, 0  ;;  %v4728_v22 = vand.u32 4294901760, %v4643_v11 }
 0x1b2   :  { %7470 = vmatprep.subr.bf16.mxu0 %v8152_v51  ;;  %v4718_v42 = vand.u32 4294901760, %v4640_v32 }
 0x1b6   :  { %6982 = vmatmul.mubr.f32.vlgmr.msra.gmra.mrb[6].mxu1 %v2926_v36 }
 0x1b7   :  { %7416 = vmatpush3.bf16.xpose.msra.mxu1 %v8384_v49  ;;  %6988 = vmatprep.mubr.f32.mxu1 %v8531_v4  ;;  %v4719_v49 = vsub.f32 %v4640_v32, %v4718_v42 }
 0x1b8   :  { %7418 = vmatprep.subr.bf16.mxu1 %v8376_v7  ;;  %7080 = vmatmul.mubr.f32.vlgmr.msra.gmra.mrb[6].mxu0 %v4215_v9 }
 0x1b9   :  { %7472 = vmatpush3.bf16.xpose.msra.mxu0 %v8152_v51  ;;  %7086 = vmatprep.mubr.f32.mxu0 %v4206_v21 }
 0x1ba   :  { %7474 = vmatprep.subr.bf16.mxu0 %v8263_v45 }
 0x1be   :  { %6989 = vmatmul.mubr.f32.vlgmr.msra.gmra.mrb[6].mxu1 %v8542_v25 }
 0x1bf   :  { %7420 = vmatpush3.bf16.xpose.msra.mxu1 %v8376_v7  ;;  %6995 = vmatprep.mubr.f32.mxu1 %v2913_v12  ;;  %v4720_v7 = vand.u32 4294901760, %v4719_v49 }
 0x1c0   :  { %7422 = vmatprep.subr.bf16.mxu1 %v8328_v3  ;;  %7087 = vmatmul.mubr.f32.vlgmr.msra.gmra.mrb[6].mxu0 %v4216_v35 }
 0x1c1   :  { %7476 = vmatpush3.bf16.xpose.msra.mxu0 %v8263_v45  ;;  %7093 = vmatprep.mubr.f32.mxu0 %v8508_v63  ;;  %v4729_v45 = vsub.f32 %v4643_v11, %v4728_v22  ;;  %v4721_v34 = vsub.f32 %v4719_v49, %v4720_v7 }
 0x1c2   :  { %7478 = vmatprep.subr.bf16.mxu0 %v8152_v51 }
 0x1c3   :  { %v4730_v55 = vand.u32 4294901760, %v4729_v45  ;;  %v4722_v17 = vand.u32 4294901760, %v4721_v34 }
 0x1c6   :  { %6996 = vmatmul.mubr.f32.vlgmr.msra.gmra.mrb[6].mxu1 %v2923_v50 }
 0x1c7   :  { %7424 = vmatpush3.bf16.xpose.msra.mxu1 %v8328_v3  ;;  %7002 = vmatprep.mubr.f32.mxu1 %v2914_v59 }
 0x1c8   :  { %7426 = vmatprep.subr.bf16.mxu1 %v8378_v19  ;;  %7094 = vmatmul.mubr.f32.vlgmr.msra.gmra.mrb[6].mxu0 %v8520_v40 }
 0x1c9   :  { %7480 = vmatpush3.bf16.xpose.msra.mxu0 %v8152_v51  ;;  %7100 = vmatprep.mubr.f32.mxu0 %v8508_v63  ;;  %v4731_v51 = vsub.f32 %v4729_v45, %v4730_v55 }
 0x1ca   :  { %7482 = vmatprep.subr.bf16.mxu0 %v8400_v28 }
 0x1cb   :  { %v4732_v61 = vand.u32 4294901760, %v4731_v51 }
 0x1ce   :  { %7003 = vmatmul.mubr.f32.vlgmr.msra.gmra.mrb[6].mxu1 %v2924_v54 }
 0x1cf   :  { %7428 = vmatpush3.bf16.xpose.msra.mxu1 %v8378_v19  ;;  %7009 = vmatprep.mubr.f32.mxu1 %v8531_v4  ;;  %v8859_v19 = vmov 0.0|0.0  }
 0x1d0   :  { %7430 = vmatprep.subr.bf16.mxu1 %v8328_v3  ;;  %7101 = vmatmul.mubr.f32.vlgmr.msra.gmra.mrb[6].mxu0 %v8520_v40 }
 0x1d1   :  { %7484 = vmatpush3.bf16.xpose.msra.mxu0 %v8400_v28  ;;  %7107 = vmatprep.mubr.f32.mxu0 %v4722_v17 }
 0x1d2   :  { %7486 = vmatprep.subr.bf16.mxu0 %v8452_v13 }
 0x1d6   :  { %7010 = vmatmul.mubr.f32.vlgmr.msra.gmra.mrb[6].mxu1 %v8542_v25 }
 0x1d7   :  { %7432 = vmatpush3.bf16.xpose.msra.mxu1 %v8328_v3  ;;  %7016 = vmatprep.mubr.f32.mxu1 %v8531_v4  ;;  %v5154_v3 = vsel %vm1230_vm2, %v8471_v10, 0  ;;  %v5243_v10 = vsub.f32 %v5157_v30, %v5242_v47 }
 0x1d8   :  { %7108 = vmatmul.mubr.f32.vlgmr.msra.gmra.mrb[6].mxu0 %v4732_v61  ;;  %7529 = vmatprep.subr.bf16.mxu1 %v8859_v19 }
 0x1d9   :  { %7488 = vmatpush3.bf16.xpose.msra.mxu0 %v8452_v13  ;;  %7114 = vmatprep.mubr.f32.mxu0 %v4718_v42  ;;  %v5232_v13 = vand.u32 4294901760, %v5154_v3  ;;  %v5244_v6 = vand.u32 4294901760, %v5243_v10 }
 0x1da   :  { %7490 = vmatprep.subr.bf16.mxu0 %v8424_v52 }
 0x1de   :  { %7017 = vmatmul.mubr.f32.vlgmr.msra.gmra.mrb[6].mxu1 %v8542_v25 }
 0x1df   :  { %7195 = vmatprep.mubr.msk.f32.mxu1 %vm7804_vm0, %v8860_v44 }
 0x1e0   :  { %7115 = vmatmul.mubr.f32.vlgmr.msra.gmra.mrb[6].mxu0 %v4728_v22 }
 0x1e1   :  { %7492 = vmatpush3.bf16.xpose.msra.mxu0 %v8424_v52  ;;  %7121 = vmatprep.mubr.f32.mxu0 %v4719_v49  ;;  %v5233_v52 = vsub.f32 %v5154_v3, %v5232_v13 }
 0x1e2   :  { %7494 = vmatprep.subr.bf16.mxu0 %v8400_v28 }
 0x1e3   :  { %v5234_v1 = vand.u32 4294901760, %v5233_v52 }
 0x1e5   :  { %v5235_v5 = vsub.f32 %v5233_v52, %v5234_v1 }
 0x1e7   :  { %v5236_v53 = vand.u32 4294901760, %v5235_v5 }
 0x1e8   :  { %7122 = vmatmul.mubr.f32.vlgmr.msra.gmra.mrb[6].mxu0 %v4729_v45 }
 0x1e9   :  { %7496 = vmatpush3.bf16.xpose.msra.mxu0 %v8400_v28  ;;  %7128 = vmatprep.mubr.f32.mxu0 %v4720_v7 }
 0x1ea   :  { %7498 = vmatprep.subr.bf16.mxu0 %v8434_v26 }
 0x1f0   :  { %7129 = vmatmul.mubr.f32.vlgmr.msra.gmra.mrb[6].mxu0 %v4730_v55 }
 0x1f1   :  { %7500 = vmatpush3.bf16.xpose.msra.mxu0 %v8434_v26  ;;  %7135 = vmatprep.mubr.f32.mxu0 %v4718_v42  ;;  %v5245_v26 = vsub.f32 %v5243_v10, %v5244_v6 }
 0x1f2   :  { %7502 = vmatprep.subr.bf16.mxu0 %v8400_v28 }
 0x1f3   :  { %v5246_v18 = vand.u32 4294901760, %v5245_v26 }
 0x1f8   :  { %7136 = vmatmul.mubr.f32.vlgmr.msra.gmra.mrb[6].mxu0 %v4728_v22 }
 0x1f9   :  { %7504 = vmatpush3.bf16.xpose.msra.mxu0 %v8400_v28  ;;  %7142 = vmatprep.mubr.f32.mxu0 %v4718_v42  ;;  %v1229_v28 = vstv %s61_s5 }
 0x1fa   :  { %7506 = vmatprep.subr.bf16.mxu0 %v8454_v60 }
 0x200   :  { %7143 = vmatmul.mubr.f32.vlgmr.msra.gmra.mrb[6].mxu0 %v4728_v22 }
 0x201   :  { %7508 = vmatpush3.bf16.xpose.msra.mxu0 %v8454_v60  ;;  %7149 = vmatprep.mubr.f32.mxu0 %v5236_v53 }
 0x202   :  { %7510 = vmatprep.subr.bf16.mxu0 %v8485_v33 }
 0x208   :  { %7150 = vmatmul.mubr.f32.vlgmr.msra.gmra.mrb[6].mxu0 %v5246_v18 }
 0x209   :  { %7512 = vmatpush3.bf16.xpose.msra.mxu0 %v8485_v33  ;;  %7156 = vmatprep.mubr.f32.mxu0 %v5232_v13 }
 0x20a   :  { %7514 = vmatprep.subr.bf16.mxu0 %v8474_v56 }
 0x210   :  { %7157 = vmatmul.mubr.f32.vlgmr.msra.gmra.mrb[6].mxu0 %v5242_v47 }
 0x211   :  { %7516 = vmatpush3.bf16.xpose.msra.mxu0 %v8474_v56  ;;  %7163 = vmatprep.mubr.f32.mxu0 %v5233_v52 }
 0x212   :  { %7518 = vmatprep.subr.bf16.mxu0 %v8454_v60 }
 0x218   :  { %7164 = vmatmul.mubr.f32.vlgmr.msra.gmra.mrb[6].mxu0 %v5243_v10 }
 0x219   :  { %7520 = vmatpush3.bf16.xpose.msra.mxu0 %v8454_v60  ;;  %7170 = vmatprep.mubr.f32.mxu0 %v5234_v1 }
 0x21a   :  { %7522 = vmatprep.subr.bf16.mxu0 %v8482_v39 }
 0x220   :  { %7171 = vmatmul.mubr.f32.vlgmr.msra.gmra.mrb[6].mxu0 %v5244_v6 }
 0x221   :  { %7524 = vmatpush3.bf16.xpose.msra.mxu0 %v8482_v39  ;;  %7177 = vmatprep.mubr.f32.mxu0 %v5232_v13 }
 0x222   :  { %7526 = vmatprep.subr.bf16.mxu0 %v8454_v60 }
 0x228   :  { %7178 = vmatmul.mubr.f32.vlgmr.msra.gmra.mrb[6].mxu0 %v5242_v47 }
 0x229   :  { %7528 = vmatpush3.bf16.xpose.msra.mxu0 %v8454_v60  ;;  %7184 = vmatprep.mubr.f32.mxu0 %v5232_v13 }
 0x230   :  { %7185 = vmatmul.mubr.f32.vlgmr.msra.gmra.mrb[6].mxu0 %v5242_v47 }
 0x243   :  { %v6892_v56 = vpop.f32.mrb[2].mxu0 }
 0x244   :  { %v7571_v23 = vadd.f32 %v6892_v56, %v1229_v28  ;;  %v1735_v38 = vpop.f32.mrb[3].mxu0 }
 0x245   :  { %v7572_v29 = vadd.f32 %v1735_v38, %v1229_v28 }
 0x246   :  { %v8617_v16 = vmax.f32 %v7571_v23, 0.0 }
 0x247   :  { %v8619_v15 = vmax.f32 %v7572_v29, 0.0 }
 0x248   :  { %v3356_v39 = vsel %vm3354_vm7, %v8617_v16, 0.0  ;;  %v3369_v58 = vmul.f32 %v8617_v16, %v8617_v16 }
 0x249   :  { %v3355_v60 = vsel %vm3354_vm7, %v8619_v15, 0.0  ;;  %v3368_v33 = vmul.f32 %v8619_v15, %v8619_v15 }
 0x24a   :  { %v3357_v48 = vadd.f32 %v3356_v39, %v3355_v60  ;;  %v3371_v37 = vsel %vm3354_vm7, %v3369_v58, 0.0 }
 0x24b   :  { %v3370_v62 = vsel %vm3354_vm7, %v3368_v33, 0.0 }
 0x24c   :  { %3358 = vadd.xlane.f32.xlu0 %v3357_v48  ;;  %v3372_v63 = vadd.f32 %v3371_v37, %v3370_v62 }
 0x250   :  { %3373 = vadd.xlane.f32.xlu0 %v3372_v63 }
 0x273   :  { %v7060_v27 = vpop.f32.mrb[4].mxu0 }
 0x274   :  { %v7573_v24 = vadd.f32 %v7060_v27, %v1229_v28  ;;  %v4091_v40 = vpop.f32.mrb[5].mxu0 }
 0x275   :  { %v7574_v21 = vadd.f32 %v4091_v40, %v1229_v28 }
 0x276   :  { %v8631_v9 = vmax.f32 %v7573_v24, 0.0 }
 0x277   :  { %v8633_v0 = vmax.f32 %v7574_v21, 0.0 }
 0x278   :  { %v5674_v20 = vsel %vm3354_vm7, %v8631_v9, 0.0  ;;  %v5687_v49 = vmul.f32 %v8631_v9, %v8631_v9 }
 0x279   :  { %v5673_v4 = vsel %vm3354_vm7, %v8633_v0, 0.0  ;;  %v5686_v42 = vmul.f32 %v8633_v0, %v8633_v0 }
 0x27a   :  { %v5675_v35 = vadd.f32 %v5674_v20, %v5673_v4  ;;  %v5689_v7 = vsel %vm3354_vm7, %v5687_v49, 0.0 }
 0x27b   :  { %v5688_v22 = vsel %vm3354_vm7, %v5686_v42, 0.0 }
 0x27c   :  { %5676 = vadd.xlane.f32.xlu0 %v5675_v35  ;;  %v5690_v45 = vadd.f32 %v5689_v7, %v5688_v22 }
 0x2b1   :  { %v7018_v12 = vpop.f32.mrb[6].mxu1 }
 0x2b2   :  { %v3351_v31 = vadd.f32 %v7018_v12, %v3349_v14  ;;  %v3337_v46 = vpop.f32.mrb[7].mxu1 }
 0x2b3   :  { %v3350_v25 = vadd.f32 %v3349_v14, %v3337_v46 }
 0x2b4   :  { %v8639_v59 = vmax.f32 %v3351_v31, 0.0 }
 0x2b5   :  { %v8641_v8 = vmax.f32 %v3350_v25, 0.0 }
 0x2b6   :  { %v3452_v50 = vsel %vm3354_vm7, %v8639_v59, 0.0  ;;  %v3465_v2 = vmul.f32 %v8639_v59, %v8639_v59 }
 0x2b7   :  { %v3451_v54 = vsel %vm3354_vm7, %v8641_v8, 0.0  ;;  %v3464_v43 = vmul.f32 %v8641_v8, %v8641_v8 }
 0x2b8   :  { %v3453_v57 = vadd.f32 %v3452_v50, %v3451_v54  ;;  %v3467_v32 = vsel %vm3354_vm7, %v3465_v2, 0.0 }
 0x2b9   :  { %v3466_v36 = vsel %vm3354_vm7, %v3464_v43, 0.0 }
 0x2ba   :  { %3454 = vadd.xlane.f32.xlu1 %v3453_v57  ;;  %v3468_v11 = vadd.f32 %v3467_v32, %v3466_v36 }
 0x2be   :  { %3469 = vadd.xlane.f32.xlu1 %v3468_v11 }
 0x2c2   :  { %5691 = vadd.xlane.f32.xlu1 %v5690_v45 }
 0x2d9   :  { %v3359_v34 = vpop.xlane.xlu0 %3358 }
 0x2da   :  { %v3360_v55 = vrot.slane %v3359_v34, 4 }
 0x2dc   :  { %v3361_v17 = vadd.f32 %v3360_v55, %v3359_v34 }
 0x2dd   :  { %v3374_v51 = vpop.xlane.xlu0 %3373 }
 0x2de   :  { %v3362_v61 = vrot.slane %v3361_v17, 2  ;;  %v3375_v3 = vrot.slane %v3374_v51, 4 }
 0x2e0   :  { %v3376_v13 = vadd.f32 %v3375_v3, %v3374_v51  ;;  %v3363_v52 = vadd.f32 %v3362_v61, %v3361_v17 }
 0x2e2   :  { %v3377_v30 = vrot.slane %v3376_v13, 2  ;;  %v3364_v47 = vrot.slane %v3363_v52, 1 }
 0x2e4   :  { %v3365_v1 = vadd.f32 %v3364_v47, %v3363_v52  ;;  %v3378_v10 = vadd.f32 %v3377_v30, %v3376_v13 }
 0x2e6   :  { %7702 = vpush %v3365_v1  ;;  %v3379_v5 = vrot.slane %v3378_v10, 1 }
 0x2e8   :  { %v3380_v6 = vadd.f32 %v3379_v5, %v3378_v10 }
 0x2ea   :  { %7704 = vpush %v3380_v6 }
 0x303   :  { %v7186_v53 = vpop.f32.mrb[6].mxu0 }
 0x304   :  { %v5670_v26 = vadd.f32 %v7186_v53, %v3349_v14  ;;  %v5657_v18 = vpop.f32.mrb[7].mxu0 }
 0x305   :  { %v5669_v28 = vadd.f32 %v5657_v18, %v3349_v14 }
 0x306   :  { %v8659_v56 = vmax.f32 %v5670_v26, 0.0 }
 0x307   :  { %v8661_v23 = vmax.f32 %v5669_v28, 0.0 }
 0x308   :  { %v5770_v38 = vsel %vm3354_vm7, %v8659_v56, 0.0  ;;  %v5783_v29 = vmul.f32 %v8659_v56, %v8659_v56 }
 0x309   :  { %v5769_v39 = vsel %vm3354_vm7, %v8661_v23, 0.0  ;;  %v5782_v58 = vmul.f32 %v8661_v23, %v8661_v23  ;;  %v5677_v49 = vpop.xlane.xlu0 %5676 }
 0x30a   :  { %v5771_v60 = vadd.f32 %v5770_v38, %v5769_v39  ;;  %v5785_v33 = vsel %vm3354_vm7, %v5783_v29, 0.0  ;;  %v5678_v22 = vrot.slane %v5677_v49, 4 }
 0x30b   :  { %v5784_v48 = vsel %vm3354_vm7, %v5782_v58, 0.0 }
 0x30c   :  { %5772 = vadd.xlane.f32.xlu0 %v5771_v60  ;;  %v5786_v62 = vadd.f32 %v5785_v33, %v5784_v48 }
 0x30e   :  { %5787 = vadd.xlane.f32.xlu1 %v5786_v62 }
 0x317   :  { %s7703_s20 = spop %7702 }
 0x318   :  { %s8673_s21 = smul.f32 0.00390625, %s7703_s20 }
 0x31a   :  { %s3383_s22 = smul.f32 %s8673_s21, %s8673_s21  ;;  %v3385_v54 = vstv %s8673_s21 }
 0x31b   :  { %s7705_s0 = spop %7704  ;;  %v3386_v43 = vsub.f32 %v8619_v15, %v3385_v54  ;;  %v3387_v32 = vsub.f32 %v8617_v16, %v3385_v54  ;;  %v5679_v15 = vadd.f32 %v5678_v22, %v5677_v49 }
 0x31c   :  { %s3382_s3 = smul.f32 0.00390625, %s7705_s0 }
 0x31d   :  { %v5680_v45 = vrot.slane %v5679_v15, 2 }
 0x31e   :  { %s3384_s23 = ssub.f32 %s3382_s3, %s3383_s22 }
 0x31f   :  { %v5681_v17 = vadd.f32 %v5680_v45, %v5679_v15 }
 0x320   :  { %s3388_s24 = sadd.f32 1e-05, %s3384_s23 }
 0x321   :  { %v5682_v61 = vrot.slane %v5681_v17, 1 }
 0x322   :  { %v3389_v37 = vstv %s3388_s24 }
 0x323   :  { %7731 = vrsqrt.f32 %v3389_v37  ;;  %v5683_v52 = vadd.f32 %v5682_v61, %v5681_v17 }
 0x32d   :  { %v7732_v63 = vpop.eup %7731 }
 0x32e   :  { %7706 = vpush %v7732_v63 }
 0x347   :  { %v3455_v27 = vpop.xlane.xlu1 %3454 }
 0x348   :  { %v3456_v24 = vrot.slane %v3455_v27, 4 }
 0x34a   :  { %v3457_v40 = vadd.f32 %v3456_v24, %v3455_v27 }
 0x34b   :  { %v3470_v21 = vpop.xlane.xlu1 %3469 }
 0x34c   :  { %v3458_v20 = vrot.slane %v3457_v40, 2  ;;  %v3471_v4 = vrot.slane %v3470_v21, 4 }
 0x34e   :  { %v3472_v35 = vadd.f32 %v3471_v4, %v3470_v21  ;;  %v3459_v14 = vadd.f32 %v3458_v20, %v3457_v40 }
 0x34f   :  { %v5692_v11 = vpop.xlane.xlu1 %5691 }
 0x350   :  { %v3473_v12 = vrot.slane %v3472_v35, 2  ;;  %v3460_v31 = vrot.slane %v3459_v14, 1  ;;  %v5693_v7 = vrot.slane %v5692_v11, 4 }
 0x352   :  { %v3461_v46 = vadd.f32 %v3460_v31, %v3459_v14  ;;  %v3474_v25 = vadd.f32 %v3473_v12, %v3472_v35  ;;  %v5694_v16 = vadd.f32 %v5693_v7, %v5692_v11 }
 0x354   :  { %7708 = vpush %v3461_v46  ;;  %v3475_v50 = vrot.slane %v3474_v25, 1  ;;  %v5695_v34 = vrot.slane %v5694_v16, 2 }
 0x356   :  { %v3476_v2 = vadd.f32 %v3475_v50, %v3474_v25  ;;  %v5696_v51 = vadd.f32 %v5695_v34, %v5694_v16 }
 0x358   :  { %7710 = vpush %v3476_v2  ;;  %v5697_v3 = vrot.slane %v5696_v51, 1 }
 0x35a   :  { %v5698_v30 = vadd.f32 %v5697_v3, %v5696_v51 }
 0x35f   :  { %s7707_s25 = spop %7706 }
 0x360   :  { %v3392_v57 = vstv %s7707_s25 }
 0x361   :  { %v8679_v36 = vmul.f32 %v3392_v57, %v3386_v43  ;;  %v8683_v42 = vmul.f32 %v3392_v57, %v3387_v32 }
 0x363   :  { %3395 = vxpose.xlu0.b32.start [1/2] (short) (narrow) %v8679_v36, 16 }
 0x367   :  { %3396 = vxpose.xlu0.b32.end [2/2] (short) (narrow) %v8683_v42, 16 }
 0x385   :  { %s7709_s26 = spop %7708 }
 0x386   :  { %s8686_s27 = smul.f32 0.00390625, %s7709_s26 }
 0x388   :  { %s3479_s28 = smul.f32 %s8686_s27, %s8686_s27  ;;  %v3481_v47 = vstv %s8686_s27 }
 0x389   :  { %s7711_s29 = spop %7710  ;;  %v3482_v5 = vsub.f32 %v8641_v8, %v3481_v47  ;;  %v3483_v28 = vsub.f32 %v8639_v59, %v3481_v47 }
 0x38a   :  { %s3478_s30 = smul.f32 0.00390625, %s7711_s29 }
 0x38c   :  { %s3480_s10 = ssub.f32 %s3478_s30, %s3479_s28 }
 0x38e   :  { %s3484_s11 = sadd.f32 1e-05, %s3480_s10 }
 0x390   :  { %v3485_v55 = vstv %s3484_s11 }
 0x391   :  { %7733 = vrsqrt.f32 %v3485_v55 }
 0x399   :  { %v5773_v1 = vpop.xlane.xlu0 %5772 }
 0x39a   :  { %v5774_v6 = vrot.slane %v5773_v1, 4 }
 0x39b   :  { %v7734_v13 = vpop.eup %7733  ;;  %v5788_v10 = vpop.xlane.xlu1 %5787 }
 0x39c   :  { %7712 = vpush %v7734_v13  ;;  %v5789_v26 = vrot.slane %v5788_v10, 4  ;;  %v5775_v38 = vadd.f32 %v5774_v6, %v5773_v1 }
 0x39d   :  { %7714 = vpush %v5683_v52 }
 0x39e   :  { %7716 = vpush %v5698_v30  ;;  %v5790_v29 = vadd.f32 %v5789_v26, %v5788_v10  ;;  %v5776_v8 = vrot.slane %v5775_v38, 2 }
 0x3a0   :  { %v5791_v58 = vrot.slane %v5790_v29, 2  ;;  %v5777_v33 = vadd.f32 %v5776_v8, %v5775_v38 }
 0x3a2   :  { %v5792_v48 = vadd.f32 %v5791_v58, %v5790_v29  ;;  %v5778_v62 = vrot.slane %v5777_v33, 1 }
 0x3a4   :  { %v5793_v59 = vrot.slane %v5792_v48, 1  ;;  %v5779_v63 = vadd.f32 %v5778_v62, %v5777_v33 }
 0x3a6   :  { %v5794_v27 = vadd.f32 %v5793_v59, %v5792_v48 }
 0x3cd   :  { %s7713_s12 = spop %7712 }
 0x3ce   :  { %v3488_v53 = vstv %s7713_s12  ;;  %s7715_s13 = spop %7714 }
 0x3cf   :  { %s8692_s4 = smul.f32 0.00390625, %s7715_s13  ;;  %s7717_s14 = spop %7716  ;;  %v3489_v18 = vmul.f32 %v3488_v53, %v3482_v5  ;;  %v8697_v39 = vmul.f32 %v3488_v53, %v3483_v28 }
 0x3d0   :  { %s5700_s1 = smul.f32 0.00390625, %s7717_s14 }
 0x3d1   :  { %s5701_s15 = smul.f32 %s8692_s4, %s8692_s4  ;;  %3491 = vxpose.xlu1.b32.start [1/2] (short) (narrow) %v3489_v18, 16  ;;  %v5703_v24 = vstv %s8692_s4 }
 0x3d2   :  { %v5704_v40 = vsub.f32 %v8633_v0, %v5703_v24  ;;  %v5705_v4 = vsub.f32 %v8631_v9, %v5703_v24 }
 0x3d3   :  { %s5702_s16 = ssub.f32 %s5700_s1, %s5701_s15 }
 0x3d5   :  { %s5706_s17 = sadd.f32 1e-05, %s5702_s16  ;;  %3492 = vxpose.xlu1.b32.end [2/2] (short) (narrow) %v8697_v39, 16  ;;  %s7806_s16 = smov [#allocation5]  }
 0x3d7   :  { %v5707_v60 = vstv %s5706_s17  ;;  %s6389_s17 = sshll.u32 %s7806_s16, 4  ;;  %s6390_s17 = int_to_ptr.vmem [resolvable:$true] %s6389_s17 }
 0x3d8   :  { %7735 = vrsqrt.f32 %v5707_v60  ;;  %p7781_p6 = scmp.lt.s32.totalorder %s6390_s17, %s6390_s17 }
 0x3e2   :  { %v7736_v37 = vpop.eup %7735 }
 0x3e3   :  { %7718 = vpush %v7736_v37  ;;  %v3411_v12 = vpop.trf.xlu0 }
 0x3e4   :  { %7720 = vpush %v5779_v63  ;;  %v3427_v31 = vadd.f32 %v3411_v12, %v8679_v36 }
 0x3e5   :  { %7722 = vpush %v5794_v27 }
 0x3e6   :  { %v3429_v46 = vmul.f32 1.442695, %v3427_v31 }
 0x3e7   :  { %v3412_v15 = vpop.trf.xlu0 }
 0x3e8   :  { %v3428_v16 = vadd.f32 %v3412_v15, %v8683_v42 }
 0x3ea   :  { %v3431_v34 = vmul.f32 1.442695, %v3428_v16 }
 0x414   :  { %s7719_s8 = spop %7718 }
 0x415   :  { %v5710_v21 = vstv %s7719_s8  ;;  %s7721_s18 = spop %7720  ;;  %s7776_s8 = scalar_lea.vmem %s6390_s17, 32 }
 0x416   :  { %s8702_s5 = smul.f32 0.00390625, %s7721_s18  ;;  %s7723_s19 = spop %7722  ;;  %v5711_v20 = vmul.f32 %v5710_v21, %v5704_v40  ;;  %v5712_v35 = vmul.f32 %v5710_v21, %v5705_v4 }
 0x417   :  { %s5796_s20 = smul.f32 0.00390625, %s7723_s19  ;;  %p7777_p5 = scmp.ne.s32.totalorder %s6390_s17, %s7776_s8 }
 0x418   :  { %s5797_s21 = smul.f32 %s8702_s5, %s8702_s5  ;;  %5713 = vxpose.xlu0.b32.start [1/2] (short) (narrow) %v5711_v20, 16  ;;  %v5799_v43 = vstv %s8702_s5  ;;  %p7782_p7 = scmp.lt.s32.totalorder %s7776_s8, %s7776_s8 }
 0x419   :  { %v5800_v57 = vsub.f32 %v8661_v23, %v5799_v43  ;;  %v5801_v36 = vsub.f32 %v8659_v56, %v5799_v43 }
 0x41a   :  { %s5798_s22 = ssub.f32 %s5796_s20, %s5797_s21  ;;  %p7783_p8 = por %p7782_p7, %p7781_p6 }
 0x41c   :  { %s5802_s0 = sadd.f32 1e-05, %s5798_s22  ;;  %5714 = vxpose.xlu0.b32.end [2/2] (short) (narrow) %v5712_v35, 16  ;;  %p7784_p9 = pnand %p7783_p8, %p7777_p5 }
 0x41e   :  { %v5803_v14 = vstv %s5802_s0 }
 0x41f   :  { %7737 = vrsqrt.f32 %v5803_v14 }
 0x420   :  { %7739 = vpow2.f32 %v3429_v46 }
 0x429   :  { %v7738_v0 = vpop.eup %7737 }
 0x42a   :  { %7724 = vpush %v7738_v0  ;;  %v8708_v25 = vpop.eup %7739 }
 0x42b   :  { %v3433_v9 = vsel %vm3354_vm7, %v8708_v25, 0.0 }
 0x449   :  { %3434 = vadd.xlane.f32.xlu0 %v3433_v9 }
 0x451   :  { %v3507_v50 = vpop.trf.xlu1 }
 0x452   :  { %v3523_v2 = vadd.f32 %v3507_v50, %v3489_v18 }
 0x454   :  { %v3525_v54 = vmul.f32 1.442695, %v3523_v2 }
 0x455   :  { %v3508_v45 = vpop.trf.xlu1 }
 0x456   :  { %7741 = vpow2.f32 %v3525_v54  ;;  %v3524_v23 = vadd.f32 %v3508_v45, %v8697_v39 }
 0x457   :  { %7743 = vpow2.f32 %v3431_v34 }
 0x458   :  { %v3527_v55 = vmul.f32 1.442695, %v3524_v23 }
 0x45a   :  { %7745 = vpow2.f32 %v3527_v55 }
 0x45b   :  { %s7725_s3 = spop %7724 }
 0x45c   :  { %v5806_v32 = vstv %s7725_s3 }
 0x45d   :  { %v5807_v49 = vmul.f32 %v5806_v32, %v5800_v57  ;;  %v5808_v22 = vmul.f32 %v5806_v32, %v5801_v36 }
 0x45f   :  { %5809 = vxpose.xlu1.b32.start [1/2] (short) (narrow) %v5807_v49, 16 }
 0x460   :  { %v8715_v11 = vpop.eup %7741 }
 0x461   :  { %v3529_v7 = vsel %vm3354_vm7, %v8715_v11, 0.0  ;;  %v7744_v56 = vpop.eup %7743 }
 0x462   :  { %3530 = vadd.xlane.f32.xlu0 %v3529_v7  ;;  %v3436_v17 = vsel %vm3354_vm7, %v7744_v56, 0.0 }
 0x463   :  { %5810 = vxpose.xlu1.b32.end [2/2] (short) (narrow) %v5808_v22, 16 }
 0x464   :  { %v7746_v51 = vpop.eup %7745 }
 0x465   :  { %v3532_v61 = vsel %vm3354_vm7, %v7746_v51, 0.0 }
 0x48a   :  { %3437 = vadd.xlane.f32.xlu1 %v3436_v17 }
 0x48e   :  { %3533 = vadd.xlane.f32.xlu1 %v3532_v61 }
 0x498   :  { %v5729_v3 = vpop.trf.xlu0 }
 0x499   :  { %v5745_v13 = vadd.f32 %v5729_v3, %v5711_v20 }
 0x49b   :  { %v5747_v52 = vmul.f32 1.442695, %v5745_v13 }
 0x49c   :  { %v5730_v30 = vpop.trf.xlu0 }
 0x49d   :  { %7747 = vpow2.f32 %v5747_v52  ;;  %v5746_v42 = vadd.f32 %v5730_v30, %v5712_v35 }
 0x49f   :  { %v5749_v47 = vmul.f32 1.442695, %v5746_v42 }
 0x4a1   :  { %7749 = vpow2.f32 %v5749_v47 }
 0x4a7   :  { %v8723_v1 = vpop.eup %7747 }
 0x4a8   :  { %v5751_v10 = vsel %vm3354_vm7, %v8723_v1, 0.0 }
 0x4a9   :  { %5752 = vadd.xlane.f32.xlu0 %v5751_v10 }
 0x4ab   :  { %v8727_v5 = vpop.eup %7749 }
 0x4ac   :  { %v5754_v6 = vsel %vm3354_vm7, %v8727_v5, 0.0 }
 0x4ad   :  { %5755 = vadd.xlane.f32.xlu1 %v5754_v6 }
 0x4d6   :  { %v3435_v33 = vpop.xlane.xlu0 %3434 }
 0x4df   :  { %v5825_v53 = vpop.trf.xlu1 }
 0x4e0   :  { %v5841_v26 = vadd.f32 %v5825_v53, %v5807_v49 }
 0x4e2   :  { %v5843_v18 = vmul.f32 1.442695, %v5841_v26 }
 0x4e3   :  { %v5826_v28 = vpop.trf.xlu1 }
 0x4e4   :  { %7751 = vpow2.f32 %v5843_v18  ;;  %v5842_v38 = vadd.f32 %v5826_v28, %v5808_v22 }
 0x4e6   :  { %v5845_v29 = vmul.f32 1.442695, %v5842_v38 }
 0x4e8   :  { %7753 = vpow2.f32 %v5845_v29 }
 0x4ee   :  { %v8731_v39 = vpop.eup %7751 }
 0x4ef   :  { %v5847_v8 = vsel %vm3354_vm7, %v8731_v39, 0.0  ;;  %v3531_v37 = vpop.xlane.xlu0 %3530 }
 0x4f0   :  { %5848 = vadd.xlane.f32.xlu0 %v5847_v8 }
 0x4f2   :  { %v7754_v58 = vpop.eup %7753 }
 0x4f3   :  { %v5850_v60 = vsel %vm3354_vm7, %v7754_v58, 0.0 }
 0x4f4   :  { %5851 = vadd.xlane.f32.xlu1 %v5850_v60  ;;  %v54_v60 = vld [vmem:[%s8848_s6] sm:$0xff] }
 0x517   :  { %v3438_v48 = vpop.xlane.xlu1 %3437 }
 0x518   :  { %v3439_v62 = vadd.f32 %v3438_v48, %v3435_v33  ;;  %v57_v33 = vld [vmem:[%s8848_s6 + $0x18] sm:$0xff] }
 0x51a   :  { %v3440_v59 = vrot.slane %v3439_v62, 4 }
 0x51b   :  { %v3534_v63 = vpop.xlane.xlu1 %3533 }
 0x51c   :  { %v3441_v27 = vadd.f32 %v3440_v59, %v3439_v62  ;;  %v3535_v24 = vadd.f32 %v3534_v63, %v3531_v37  ;;  %v5905_v62 = vand.u32 4294901760, %v57_v33 }
 0x51e   :  { %v3442_v40 = vrot.slane %v3441_v27, 2  ;;  %v3536_v21 = vrot.slane %v3535_v24, 4 }
 0x520   :  { %v3443_v20 = vadd.f32 %v3442_v40, %v3441_v27  ;;  %v3537_v4 = vadd.f32 %v3536_v21, %v3535_v24  ;;  %v8765_v24 = vsub.f32 %v57_v33, %v5905_v62 }
 0x522   :  { %v3444_v35 = vrot.slane %v3443_v20, 1  ;;  %v3538_v14 = vrot.slane %v3537_v4, 2 }
 0x524   :  { %v3445_v0 = vadd.f32 %v3444_v35, %v3443_v20  ;;  %v3539_v12 = vadd.f32 %v3538_v14, %v3537_v4 }
 0x526   :  { %v3540_v31 = vrot.slane %v3539_v12, 1  ;;  %7755 = vrcp.f32 %v3445_v0  ;;  %v5998_v0 = vand.u32 4294901760, %v8765_v24 }
 0x528   :  { %v3541_v46 = vadd.f32 %v3540_v31, %v3539_v12 }
 0x52a   :  { %7757 = vrcp.f32 %v3541_v46 }
 0x530   :  { %v7756_v9 = vpop.eup %7755 }
 0x531   :  { %v3448_v2 = vmul.f32 %v7756_v9, %v7744_v56  ;;  %v3447_v43 = vmul.f32 %v7756_v9, %v8708_v25  ;;  %v5999_v9 = vsub.f32 %v8765_v24, %v5998_v0 }
 0x534   :  { %v7758_v50 = vpop.eup %7757 }
 0x535   :  { %v3544_v54 = vmul.f32 %v7758_v50, %v7746_v51  ;;  %v3543_v57 = vmul.f32 %v7758_v50, %v8715_v11 }
 0x536   :  { %v5753_v15 = vpop.xlane.xlu0 %5752 }
 0x537   :  { %v3546_v32 = vadd.f32 %v3544_v54, %v3448_v2  ;;  %v3545_v49 = vadd.f32 %v3543_v57, %v3447_v43  ;;  %v6000_v54 = vand.u32 4294901760, %v5999_v9 }
 0x539   :  { %v3550_v36 = vsel %vm3354_vm7, %v3546_v32, 0.0  ;;  %v3547_v22 = vsel %vm3354_vm7, %v3545_v49, 0.0 }
 0x53a   :  { %3551 = vadd.xlane.f32.xlu1 %v3550_v36  ;;  %3548 = vadd.xlane.f32.xlu0 %v3547_v22  ;;  %v5756_v7 = vpop.xlane.xlu1 %5755  ;;  %v3553_v22 = vld [vmem:[%s8844_s2] sm:$0xff] }
 0x53b   :  { %v5757_v16 = vadd.f32 %v5756_v7, %v5753_v15  ;;  %v3554_v15 = vld [vmem:[%s8844_s2 + $0x8] sm:$0xff] }
 0x53d   :  { %v5758_v45 = vrot.slane %v5757_v16, 4 }
 0x53f   :  { %v5759_v34 = vadd.f32 %v5758_v45, %v5757_v16 }
 0x541   :  { %v5760_v23 = vrot.slane %v5759_v34, 2 }
 0x543   :  { %v5761_v17 = vadd.f32 %v5760_v23, %v5759_v34 }
 0x545   :  { %v5762_v11 = vrot.slane %v5761_v17, 1 }
 0x547   :  { %v5763_v13 = vadd.f32 %v5762_v11, %v5761_v17  ;;  %v6400_v11 = vld [vmem:[%s8844_s2 + $0x18] sm:$0xff] }
 0x549   :  { %7759 = vrcp.f32 %v5763_v13 }
 0x553   :  { %v7760_v47 = vpop.eup %7759 }
 0x554   :  { %v5766_v6 = vmul.f32 %v7760_v47, %v8727_v5  ;;  %v5765_v26 = vmul.f32 %v7760_v47, %v8723_v1  ;;  %v55_v5 = vld [vmem:[%s8848_s6 + $0x8] sm:$0xff]  ;;  %v56_v1 = vld [vmem:[%s8848_s6 + $0x10] sm:$0xff] }
 0x555   :  { %v5902_v48 = vand.u32 4294901760, %v56_v1 }
 0x557   :  { %v8763_v27 = vsub.f32 %v56_v1, %v5902_v48  ;;  %v8768_v40 = vpack.c.bf16 %v5905_v62, %v5902_v48 }
 0x559   :  { %v5991_v14 = vand.u32 4294901760, %v8763_v27  ;;  %v7545_v32 = vpack.c.bf16 %v8765_v24, %v8763_v27  ;;  %v8861_v24 = vsub.s32 2, %v8056_v41 }
 0x55b   :  { %v5992_v46 = vsub.f32 %v8763_v27, %v5991_v14  ;;  %v7557_v36 = vpack.c.bf16 %v5998_v0, %v5991_v14  ;;  %v7763_v27 = vld [vmem:[%s8849_s7] sm:$0x7] }
 0x55d   :  { %v5993_v2 = vand.u32 4294901760, %v5992_v46 }
 0x55f   :  { %v7539_v57 = vpack.c.bf16 %v6000_v54, %v5993_v2 }
 0x57d   :  { %v5849_v55 = vpop.xlane.xlu0 %5848 }
 0x581   :  { %v5852_v56 = vpop.xlane.xlu1 %5851 }
 0x582   :  { %v5853_v25 = vadd.f32 %v5852_v56, %v5849_v55 }
 0x584   :  { %v5854_v51 = vrot.slane %v5853_v25, 4 }
 0x586   :  { %v5855_v61 = vadd.f32 %v5854_v51, %v5853_v25  ;;  %v6399_v51 = vld [vmem:[%s8844_s2 + $0x10] sm:$0xff] }
 0x588   :  { %v5856_v3 = vrot.slane %v5855_v61, 2 }
 0x58a   :  { %v5857_v52 = vadd.f32 %v5856_v3, %v5855_v61 }
 0x58c   :  { %v5858_v30 = vrot.slane %v5857_v52, 1 }
 0x58e   :  { %v5859_v42 = vadd.f32 %v5858_v30, %v5857_v52 }
 0x590   :  { %7761 = vrcp.f32 %v5859_v42 }
 0x59a   :  { %v7762_v10 = vpop.eup %7761 }
 0x59b   :  { %v5862_v53 = vmul.f32 %v7762_v10, %v7754_v58  ;;  %v5861_v18 = vmul.f32 %v7762_v10, %v8731_v39  ;;  %v5896_v39 = vand.u32 4294901760, %v54_v60  ;;  %v5899_v58 = vand.u32 4294901760, %v55_v5 }
 0x59d   :  { %v5864_v28 = vadd.f32 %v5862_v53, %v5766_v6  ;;  %v5863_v38 = vadd.f32 %v5861_v18, %v5765_v26  ;;  %v8757_v59 = vpack.c.bf16 %v5899_v58, %v5896_v39  ;;  %v8759_v37 = vsub.f32 %v54_v60, %v5896_v39 }
 0x59e   :  { %v8761_v63 = vsub.f32 %v55_v5, %v5899_v58 }
 0x59f   :  { %v5868_v29 = vsel %vm3354_vm7, %v5864_v28, 0.0  ;;  %v5865_v8 = vsel %vm3354_vm7, %v5863_v38, 0.0  ;;  %7531 = vmatpush3.bf16.msra.mxu1 %v8757_v59  ;;  %v5977_v21 = vand.u32 4294901760, %v8759_v37 }
 0x5a0   :  { %5869 = vadd.xlane.f32.xlu1 %v5868_v29  ;;  %5866 = vadd.xlane.f32.xlu0 %v5865_v8  ;;  %v5984_v20 = vand.u32 4294901760, %v8761_v63  ;;  %v7542_v43 = vpack.c.bf16 %v8761_v63, %v8759_v37 }
 0x5a1   :  { %7532 = vmatprep.subr.bf16.mxu1 %v8859_v19  ;;  %v5978_v4 = vsub.f32 %v8759_v37, %v5977_v21 }
 0x5a2   :  { %v5985_v35 = vsub.f32 %v8761_v63, %v5984_v20  ;;  %v7554_v49 = vpack.c.bf16 %v5984_v20, %v5977_v21  ;;  %v5891_v21 = vrot.slane %v7763_v27, %v8861_v24 }
 0x5a3   :  { %7534 = vmatpush3.bf16.msra.mxu1 %v8768_v40  ;;  %v5979_v12 = vand.u32 4294901760, %v5978_v4 }
 0x5a4   :  { %7535 = vmatprep.subr.bf16.mxu1 %v8859_v19  ;;  %v5986_v31 = vand.u32 4294901760, %v5985_v35 }
 0x5a6   :  { %v7536_v50 = vpack.c.bf16 %v5986_v31, %v5979_v12 }
 0x5c7   :  { %v3549_v7 = vpop.xlane.xlu0 %3548  ;;  %v3552_v16 = vpop.xlane.xlu1 %3551 }
 0x5c8   :  { %v3555_v45 = vmul.f32 %v3553_v22, %v3549_v7  ;;  %v3556_v34 = vmul.f32 %v3554_v15, %v3552_v16 }
 0x5ca   :  { %v3557_v23 = vsel %vm68_vm1, %v3555_v45, 0.0  ;;  %v3558_v55 = vsel %vm68_vm1, %v3556_v34, 0.0 }
 0x5cb   :  { %v3559_v56 = vadd.f32 %v3558_v55, %v3557_v23 }
 0x5cd   :  { %v3560_v17 = vrot.slane %v3559_v56, 4 }
 0x5cf   :  { %v3561_v25 = vadd.f32 %v3560_v17, %v3559_v56 }
 0x5d1   :  { %v3562_v30 = vrot.slane %v3561_v25, 2 }
 0x5d3   :  { %v3563_v6 = vadd.f32 %v3562_v30, %v3561_v25 }
 0x5d5   :  { %v3564_v18 = vrot.slane %v3563_v6, 1 }
 0x5d7   :  { %v3565_v29 = vadd.f32 %v3564_v18, %v3563_v6 }
 0x5d9   :  { %v3566_v5 = vmul.f32 0.5, %v3565_v29 }
 0x62d   :  { %v5867_v61 = vpop.xlane.xlu0 %5866  ;;  %v5870_v3 = vpop.xlane.xlu1 %5869 }
 0x62e   :  { %v5874_v13 = vmul.f32 %v6399_v51, %v5867_v61  ;;  %v5875_v52 = vmul.f32 %v6400_v11, %v5870_v3 }
 0x630   :  { %v5876_v42 = vsel %vm68_vm1, %v5874_v13, 0.0  ;;  %v5877_v47 = vsel %vm68_vm1, %v5875_v52, 0.0 }
 0x631   :  { %v5878_v10 = vadd.f32 %v5877_v47, %v5876_v42 }
 0x633   :  { %v5879_v53 = vrot.slane %v5878_v10, 4 }
 0x635   :  { %v5880_v26 = vadd.f32 %v5879_v53, %v5878_v10 }
 0x637   :  { %v5881_v28 = vrot.slane %v5880_v26, 2 }
 0x639   :  { %v5882_v38 = vadd.f32 %v5881_v28, %v5880_v26 }
 0x63b   :  { %v5883_v8 = vrot.slane %v5882_v38, 1 }
 0x63d   :  { %v5884_v60 = vadd.f32 %v5883_v8, %v5882_v38 }
 0x63f   :  { %v5885_v1 = vmul.f32 0.5, %v5884_v60 }
 0x641   :  { %v5887_v39 = vsel %vm5886_vm8, %v3566_v5, %v5885_v1 }
 0x642   :  { %v5893_v58 = vsel %vm68_vm1, %v5887_v39, 0 }
 0x643   :  { %v5964_v33 = vand.u32 4294901760, %v5893_v58 }
 0x645   :  { %v5965_v48 = vsub.f32 %v5893_v58, %v5964_v33 }
 0x647   :  { %v5966_v62 = vand.u32 4294901760, %v5965_v48 }
 0x649   :  { %v5967_v37 = vsub.f32 %v5965_v48, %v5966_v62 }
 0x64b   :  { %v5968_v63 = vand.u32 4294901760, %v5967_v37 }
 0x64d   :  { %7196 = vmatmul.mubr.f32.vlgmr.msra.gmra.mrb[8].mxu1 %v5968_v63 }
 0x64e   :  { %7537 = vmatpush3.bf16.msra.mxu1 %v7536_v50  ;;  %7206 = vmatprep.mubr.msk.f32.mxu1 %vm7804_vm0, %v8860_v44 }
 0x64f   :  { %7538 = vmatprep.subr.bf16.mxu1 %v8859_v19 }
 0x652   :  { %7540 = vmatpush3.bf16.msra.mxu1 %v7539_v57 }
 0x653   :  { %7541 = vmatprep.subr.bf16.mxu1 %v8859_v19 }
 0x655   :  { %7207 = vmatmul.mubr.f32.vlgmr.msra.gmra.mrb[8].mxu1 %v5964_v33 }
 0x656   :  { %7543 = vmatpush3.bf16.msra.mxu1 %v7542_v43  ;;  %7217 = vmatprep.mubr.msk.f32.mxu1 %vm7804_vm0, %v8860_v44 }
 0x657   :  { %7544 = vmatprep.subr.bf16.mxu1 %v8859_v19 }
 0x65a   :  { %7546 = vmatpush3.bf16.msra.mxu1 %v7545_v32 }
 0x65b   :  { %7547 = vmatprep.subr.bf16.mxu1 %v8859_v19 }
 0x65d   :  { %7218 = vmatmul.mubr.f32.vlgmr.msra.gmra.mrb[8].mxu1 %v5965_v48 }
 0x65e   :  { %7549 = vmatpush3.bf16.msra.mxu1 %v8757_v59  ;;  %7228 = vmatprep.mubr.msk.f32.mxu1 %vm7804_vm0, %v8860_v44 }
 0x65f   :  { %7550 = vmatprep.subr.bf16.mxu1 %v8859_v19 }
 0x662   :  { %7552 = vmatpush3.bf16.msra.mxu1 %v8768_v40 }
 0x663   :  { %7553 = vmatprep.subr.bf16.mxu1 %v8859_v19 }
 0x665   :  { %7229 = vmatmul.mubr.f32.vlgmr.msra.gmra.mrb[8].mxu1 %v5966_v62 }
 0x666   :  { %7555 = vmatpush3.bf16.msra.mxu1 %v7554_v49  ;;  %7239 = vmatprep.mubr.msk.f32.mxu1 %vm7804_vm0, %v8860_v44 }
 0x667   :  { %7556 = vmatprep.subr.bf16.mxu1 %v8859_v19 }
 0x66a   :  { %7558 = vmatpush3.bf16.msra.mxu1 %v7557_v36 }
 0x66b   :  { %7559 = vmatprep.subr.bf16.mxu1 %v8859_v19 }
 0x66d   :  { %7240 = vmatmul.mubr.f32.vlgmr.msra.gmra.mrb[8].mxu1 %v5964_v33 }
 0x66e   :  { %7561 = vmatpush3.bf16.msra.mxu1 %v8757_v59  ;;  %7250 = vmatprep.mubr.msk.f32.mxu1 %vm7804_vm0, %v8860_v44 }
 0x66f   :  { %7562 = vmatprep.subr.bf16.mxu1 %v8859_v19 }
 0x672   :  { %7564 = vmatpush3.bf16.msra.mxu1 %v8768_v40 }
 0x675   :  { %7251 = vmatmul.mubr.f32.vlgmr.msra.gmra.mrb[8].mxu1 %v5964_v33 }
 0x748   :  { %v6376_v20 = vpop.f32.mrb[8].mxu1 }
 0x749   :  { %v7575_v4 = vadd.f32 %v6376_v20, %v5891_v21  ;;  %v7252_v59 = vpop.f32.mrb[9].mxu1 }
 0x74b   :  { %v6380_v35 = vmax.f32 %v7575_v4, 0.0 }
 0x74d   :  { %6382 = vst.msk [vmem:[#allocation5] sm:$0x3] %vm6381_vm9, %v6380_v35 }
 0x74e   :  { %7787 = shalt.err (!%p7784_p9)
}
 0x74f   :  { %s7788_s5 = scalar_lea.hbm %s8851_s9, 32 }
 0x750   :  { %p7789_p10 = scmp.ne.s32.totalorder %s8851_s9, %s7788_s5  ;;  %p7792_p11 = scmp.lt.u32.totalorder %s7788_s5, %s8851_s9 }
 0x752   :  { %p7794_p12 = pnand %p7792_p11, %p7789_p10 }
 0x754   :  { %7797 = shalt.err (!%p7794_p12)
}
 0x755   :  { %6392 = dma.vmem_to_hbm [thread:$0]  %s6390_s17, 32, %s8851_s9, [#allocation3]  }
 0x756   :  { %7800 = dma.done.wait [#allocation3], 32  }
 0x757   :  { %7801 = vsyncadd [#allocation3], 4294967264 }
 0x758   :  { %6396 = vsyncpa [#allocation3], 1 }
 0x759   :  { %6397 = vsyncpa [#allocation4], 1 }

</bundles_post_ra>
